<compile_context>
chip_gen: v6e
topology: v6e:2x2x1
jax: 0.10.0
libtpu: 0.0.40
codegen_flags: <defaults>
</compile_context>

<pallas_src>
import functools

import jax
import jax.numpy as jnp
from jax.experimental import pallas as pl
from jax.experimental.pallas import tpu as pltpu


def _round_up(x, m):
    return ((x + m - 1) // m) * m


def _cdiv(a, b):
    return (a + b - 1) // b


def _ensemble_kernel(labels_ref, h_ref, w_ref, b_ref,
                     logits0_ref, partials_ref, *, num_models, eps):
    """Per-token-tile kernel: classifier + CE + KL consistency reg for M models.

    Emits per-tile partial sums (CE sum, KL sum, valid count); normalization
    happens once in the wrapper.  Out-of-range / ignored rows (label == -1,
    which includes OOB rows of the last partial tile) are removed with
    `jnp.where` selects so NaN/Inf from garbage data cannot leak into sums.
    """
    M = num_models
    labels = labels_ref[...]                         # [TN, 1] int32
    tn = labels.shape[0]
    c_pad = logits0_ref.shape[1]

    valid = labels != -1                             # [TN, 1] bool
    mask = valid.astype(jnp.float32)                 # [TN, 1]

    sum_probs = jnp.zeros((tn, c_pad), jnp.float32)
    sum_logq = jnp.zeros((tn, c_pad), jnp.float32)
    sum_shifted = jnp.zeros((tn, c_pad), jnp.float32)
    sum_logdenom = jnp.zeros((tn, 1), jnp.float32)

    for m in range(M):
        # --- classifier: logits_m = h_m @ W_m + b_m (MXU, bf16 in / f32 acc) ---
        logits = jnp.dot(h_ref[m], w_ref[m],
                         preferred_element_type=jnp.float32) + b_ref[m]  # [TN, C_pad]
        if m == 0:
            # bf16 store halves the logits0 HBM writeback (lane-dense, C_pad = k*128)
            logits0_ref[...] = logits.astype(logits0_ref.dtype)

        # --- stable softmax pieces (padded classes have -1e9 logits -> prob 0) ---
        mx = jnp.max(logits, axis=-1, keepdims=True)
        shifted = logits - mx
        ex = jnp.exp(shifted)
        denom = jnp.sum(ex, axis=-1, keepdims=True)
        probs = ex * pl.reciprocal(denom, approx=True)   # EUP slot, no divide

        sum_probs = sum_probs + probs
        sum_logq = sum_logq + jnp.log(probs + eps)
        # CE pieces consolidated across models; one masked reduce after the loop.
        sum_shifted = sum_shifted + shifted
        sum_logdenom = sum_logdenom + jnp.log(denom)     # single [TN,1] log per model

    # --- CE summed over models & valid tokens:
    #     nll_m = log(denom_m) - shifted_m[label]  =>  use selects (NaN-safe) ---
    cls = jax.lax.broadcasted_iota(jnp.int32, (tn, c_pad), 1)
    picked = jnp.where(jnp.logical_and(cls == labels, valid),
                       sum_shifted, jnp.float32(0.0))            # [TN, C_pad]
    ce_partial = (jnp.sum(jnp.where(valid, sum_logdenom, jnp.float32(0.0)))
                  - jnp.sum(picked))

    # --- KL(avg || p_m) summed over models in one pass:
    #     sum_m KL_m = sum_c avg * (M*log(avg+eps) - sum_m log(p_m+eps)) ---
    avg = sum_probs * jnp.float32(1.0 / M)
    kl_tok = jnp.sum(avg * (jnp.float32(M) * jnp.log(avg + eps) - sum_logq),
                     axis=-1, keepdims=True)                     # [TN, 1]
    reg_partial = jnp.sum(jnp.where(valid, kl_tok, jnp.float32(0.0)))
    nvalid_partial = jnp.sum(mask)

    # Pack the 3 per-tile scalars into an (8, 128) output block (lane-dense).
    row = jax.lax.broadcasted_iota(jnp.int32, partials_ref.shape, 0)
    col = jax.lax.broadcasted_iota(jnp.int32, partials_ref.shape, 1)
    out = jnp.where((row == 0) & (col == 0), ce_partial, jnp.float32(0.0))
    out = jnp.where((row == 0) & (col == 1), reg_partial, out)
    out = jnp.where((row == 0) & (col == 2), nvalid_partial, out)
    partials_ref[...] = out


def ensemble_loss_and_logits(h, w, b, labels, *, num_class, alpha_t=1.0,
                             token_tile=2048, eps=1e-5):
    """h: [M, N, H] (f32 or bf16); w: [M, H, C]; b: [M, 1, C]; labels: [N] int32
    (-1 = ignore). Returns (scalar loss, logits of model 0 [N, C] in f32)."""
    M, N, H = h.shape
    C = num_class
    c_pad = _round_up(C, 128)

    # --- pad class dim to lane width; padded classes get -1e9 bias so they
    #     contribute exactly 0 probability ---
    w_p = jnp.pad(w, ((0, 0), (0, 0), (0, c_pad - C)))
    b_p = jnp.pad(b.astype(jnp.float32), ((0, 0), (0, 0), (0, c_pad - C)),
                  constant_values=-1e9)

    # --- chip-aware VMEM budget (headroom: ~100 MiB on v5e/v6e, ~56 MiB on v7x) ---
    try:
        vmem_cap = int(pltpu.get_tpu_info().vmem_capacity_bytes)
    except Exception:
        vmem_cap = 128 * 1024 * 1024
    budget = min(vmem_cap - 8 * 1024 * 1024, 100 * 1024 * 1024)

    h_item = jnp.dtype(h.dtype).itemsize
    w_item = jnp.dtype(w.dtype).itemsize

    def vmem_est(tn):
        return (2 * M * tn * H * h_item              # h tile (double-buffered)
                + 2 * tn * 4                         # labels tile
                + 2 * tn * c_pad * 2                 # logits0 writeback (bf16)
                + 2 * 8 * 128 * 4                    # partials tile
                + M * H * c_pad * w_item             # weights (single-buffered)
                + M * c_pad * 4                      # bias
                + 10 * tn * c_pad * 4)               # live f32 slabs in unrolled loop

    # --- token tile: prefer >= 4 grid steps (>= 2 TC on v7x), fit VMEM budget ---
    tn = min(_round_up(token_tile, 8), max(8, _round_up(_cdiv(N, 4), 8)))
    while tn > 8 and vmem_est(tn) > budget:
        tn = max(8, _round_up(tn // 2, 8))

    g = _cdiv(N, tn)
    n_pad = g * tn
    # Only labels are padded (cheap); h is streamed unpadded — OOB rows of the
    # last tile carry label -1 and are dropped in-kernel via selects.
    labels_p = jnp.pad(labels.astype(jnp.int32), (0, n_pad - N),
                       constant_values=-1).reshape(n_pad, 1)

    vmem_limit = int(min(max(2 * vmem_est(tn), 32 * 1024 * 1024), budget))

    kernel = functools.partial(_ensemble_kernel, num_models=M, eps=eps)

    def _call(single_buffer_weights):
        const_kw = ({"pipeline_mode": pl.Buffered(1)}
                    if single_buffer_weights else {})
        grid_spec = pltpu.PrefetchScalarGridSpec(
            num_scalar_prefetch=0,
            grid=(g,),
            in_specs=[
                pl.BlockSpec((tn, 1), lambda i: (i, 0)),              # labels
                pl.BlockSpec((M, tn, H), lambda i: (0, i, 0)),        # hidden states
                pl.BlockSpec((M, H, c_pad), lambda i: (0, 0, 0),      # weights (resident)
                             **const_kw),
                pl.BlockSpec((M, 1, c_pad), lambda i: (0, 0, 0),      # bias (resident)
                             **const_kw),
            ],
            out_specs=[
                pl.BlockSpec((tn, c_pad), lambda i: (i, 0)),          # logits of model 0
                pl.BlockSpec((8, 128), lambda i: (i, 0)),             # per-tile partials
            ],
        )
        return pl.pallas_call(
            kernel,
            out_shape=(
                jax.ShapeDtypeStruct((n_pad, c_pad), jnp.bfloat16),
                jax.ShapeDtypeStruct((g * 8, 128), jnp.float32),
            ),
            grid_spec=grid_spec,
            compiler_params=pltpu.CompilerParams(
                dimension_semantics=("parallel",),
                vmem_limit_bytes=vmem_limit,
            ),
        )(labels_p, h, w_p, b_p)

    try:
        logits0, partials = _call(True)
    except Exception:
        # TODO(synk): single-buffering via pl.Buffered(1) unsupported on this
        # jax build -> fall back to default double-buffered resident weights.
        logits0, partials = _call(False)

    # --- single global normalization (never per tile) ---
    ce_total = jnp.sum(partials[:, 0])
    reg_total = jnp.sum(partials[:, 1])
    nvalid = jnp.sum(partials[:, 2])
    loss = ce_total / (nvalid * M) + alpha_t * reg_total / (M * (nvalid + 0.001))
    return loss, logits0[:N, :C].astype(jnp.float32)


def synthetic_encoder(input_ids, attention_mask, embed_table):
    """Plain-JAX stand-in for the per-model AutoModel backbone."""
    h = jnp.take(embed_table, input_ids, axis=0)            # [B, S, H]
    h = jnp.tanh(h) * attention_mask[..., None].astype(h.dtype)
    return h


def reference_forward(h, w, b, labels, num_class, alpha_t, eps=1e-5):
    """Pure-JAX reference mirroring Create_Model.forward (q_type='reg', KL, CE)."""
    M = h.shape[0]
    valid = labels != -1
    mask = valid.astype(jnp.float32)
    safe = jnp.where(valid, labels, 0)
    logits = jnp.einsum('mnh,mhc->mnc', h, w,
                        preferred_element_type=jnp.float32) + b.astype(jnp.float32)
    logp = jax.nn.log_softmax(logits, axis=-1)
    nll = -jnp.take_along_axis(logp, safe[None, :, None], axis=-1)[..., 0]  # [M, N]
    ce = jnp.sum(nll * mask[None, :], axis=-1) / jnp.sum(mask)
    loss = jnp.mean(ce)
    probs = jax.nn.softmax(logits, axis=-1)
    avg = jnp.mean(probs, axis=0)
    kl = jnp.sum(avg[None] * (jnp.log(avg + eps)[None] - jnp.log(probs + eps)),
                 axis=-1)                                    # [M, N]
    reg = jnp.sum(kl * mask[None], axis=0) / M
    reg_loss = jnp.sum(reg) / (jnp.sum(mask) + 0.001)
    return loss + alpha_t * reg_loss, logits[0]


if __name__ == "__main__":
    def run_case(seed, B, S, H, C, V, M, alpha_t=1.0):
        N = B * S
        key = jax.random.PRNGKey(seed)
        k_ids, k_lab = jax.random.split(key)
        input_ids = jax.random.randint(k_ids, (B, S), 0, V, dtype=jnp.int32)
        attention_mask = jnp.ones((B, S), dtype=jnp.int32)
        labels = jax.random.randint(k_lab, (B, S), 0, C, dtype=jnp.int32)
        labels = labels.at[:, -1].set(-1)   # some ignore_index tokens

        # Deterministic per-model parameters.
        ws, bs, hs = [], [], []
        for m in range(M):
            km = jax.random.fold_in(jax.random.PRNGKey(42), m)
            ke, kw, kb = jax.random.split(km, 3)
            embed = jax.random.normal(ke, (V, H), dtype=jnp.float32) * 0.5
            w_ = jax.random.normal(kw, (H, C), dtype=jnp.float32) * (1.0 / jnp.sqrt(H))
            b_ = jax.random.normal(kb, (C,), dtype=jnp.float32) * 0.01
            ws.append(w_)
            bs.append(b_.reshape(1, C))
            hs.append(synthetic_encoder(input_ids, attention_mask, embed).reshape(N, H))

        h = jnp.stack(hs, axis=0)            # [M, N, H] f32
        w = jnp.stack(ws, axis=0)            # [M, H, C] f32
        b = jnp.stack(bs, axis=0)            # [M, 1, C] f32
        labels_flat = labels.reshape(-1)     # [N]

        # bf16 matmul inputs (halves HBM/VMEM traffic for h), f32 accumulation.
        h_bf16 = h.astype(jnp.bfloat16)
        w_bf16 = w.astype(jnp.bfloat16)

        loss, logits0 = ensemble_loss_and_logits(h_bf16, w_bf16, b, labels_flat,
                                                 num_class=C, alpha_t=alpha_t)
        jax.block_until_ready((loss, logits0))

        # Reference with the same bf16 matmul inputs (f32 math); the kernel adds
        # bf16 logits0 storage and an approximate reciprocal -> modest tolerances.
        ref_loss, ref_logits0 = reference_forward(h_bf16, w_bf16, b, labels_flat,
                                                  C, alpha_t)
        assert jnp.allclose(loss, ref_loss, rtol=5e-3, atol=5e-3), (loss, ref_loss)
        assert jnp.allclose(logits0, ref_logits0, rtol=2e-2, atol=2e-2)

        # Sanity vs full-f32 math (only bf16 rounding of the matmul inputs differs).
        ref_loss32, _ = reference_forward(h, w, b, labels_flat, C, alpha_t)
        assert jnp.allclose(loss, ref_loss32, rtol=5e-2, atol=5e-2), (loss, ref_loss32)

    # Case 1: N = 16, exact multiple of the 8-row tile (g = 2 grid steps).
    run_case(0, B=2, S=8, H=32, C=8, V=64, M=2)
    # Case 2: ragged N = 18 (not a multiple of the tile): exercises the unpadded-h
    # path where the last tile reads OOB rows that the in-kernel label-mask
    # selects drop (NaN/Inf-safe).
    run_case(1, B=2, S=9, H=32, C=8, V=64, M=2)

    print("KERNEL_OK")
</pallas_src>

<mosaic_0001>
module attributes {stable_mosaic.version = 11 : i64} {
  func.func @_ensemble_kernel(%arg0: i32, %arg1: memref<8x1xi32, #tpu.memory_space<vmem>>, %arg2: memref<2x8x32xbf16, #tpu.memory_space<vmem>>, %arg3: memref<2x32x128xbf16, #tpu.memory_space<vmem>>, %arg4: memref<2x1x128xf32, #tpu.memory_space<vmem>>, %arg5: memref<8x128xbf16, #tpu.memory_space<vmem>>, %arg6: memref<8x128xf32, #tpu.memory_space<vmem>>) attributes {dimension_semantics = [#tpu.dimension_semantics<parallel>], iteration_bounds = array<i64: 2>, scalar_prefetch = 0 : i64, scratch_operands = 0 : i64, tpu.core_type = #tpu.core_type<tc>, window_params = [{transform_indices = @transform_0, window_bounds = array<i64: 8, 1>}, {transform_indices = @transform_1, window_bounds = array<i64: 2, 8, 32>}, {pipeline_mode = #tpu.pipeline_mode<synchronous>, transform_indices = @transform_2, window_bounds = array<i64: 2, 32, 128>}, {pipeline_mode = #tpu.pipeline_mode<synchronous>, transform_indices = @transform_3, window_bounds = array<i64: 2, 1, 128>}, {transform_indices = @transform_4, window_bounds = array<i64: 8, 128>}, {transform_indices = @transform_5, window_bounds = array<i64: 8, 128>}]} {
    %c0 = arith.constant 0 : index
    %c0_0 = arith.constant 0 : index
    %0 = vector.load %arg1[%c0, %c0_0] : memref<8x1xi32, #tpu.memory_space<vmem>>, vector<8x1xi32>
    %c-1_i32 = arith.constant -1 : i32
    %1 = vector.broadcast %c-1_i32 : i32 to vector<8x1xi32>
    %2 = arith.cmpi ne, %0, %1 : vector<8x1xi32>
    %3 = arith.extui %2 : vector<8x1xi1> to vector<8x1xi32>
    %4 = arith.sitofp %3 : vector<8x1xi32> to vector<8x1xf32>
    %cst = arith.constant 0.000000e+00 : f32
    %5 = vector.broadcast %cst : f32 to vector<8x128xf32>
    %cst_1 = arith.constant 0.000000e+00 : f32
    %6 = vector.broadcast %cst_1 : f32 to vector<8x128xf32>
    %cst_2 = arith.constant 0.000000e+00 : f32
    %7 = vector.broadcast %cst_2 : f32 to vector<8x128xf32>
    %cst_3 = arith.constant 0.000000e+00 : f32
    %8 = vector.broadcast %cst_3 : f32 to vector<8x1xf32>
    %c0_4 = arith.constant 0 : index
    %c0_5 = arith.constant 0 : index
    %c0_6 = arith.constant 0 : index
    %9 = vector.load %arg2[%c0_4, %c0_5, %c0_6] : memref<2x8x32xbf16, #tpu.memory_space<vmem>>, vector<1x8x32xbf16>
    %10 = vector.shape_cast %9 : vector<1x8x32xbf16> to vector<8x32xbf16>
    %c0_7 = arith.constant 0 : index
    %c0_8 = arith.constant 0 : index
    %c0_9 = arith.constant 0 : index
    %11 = vector.load %arg3[%c0_7, %c0_8, %c0_9] : memref<2x32x128xbf16, #tpu.memory_space<vmem>>, vector<1x32x128xbf16>
    %12 = vector.shape_cast %11 : vector<1x32x128xbf16> to vector<32x128xbf16>
    %cst_10 = arith.constant dense<0.000000e+00> : vector<8x128xf32>
    %13 = tpu.matmul %10, %12, %cst_10 {dimension_numbers = #tpu.dot_dimension_numbers<[1], [0], [0], [1], [0, 0, 1, 1], [], []>} : vector<8x32xbf16>, vector<32x128xbf16>, vector<8x128xf32> -> vector<8x128xf32>
    %c0_11 = arith.constant 0 : index
    %c0_12 = arith.constant 0 : index
    %c0_13 = arith.constant 0 : index
    %14 = vector.load %arg4[%c0_11, %c0_12, %c0_13] : memref<2x1x128xf32, #tpu.memory_space<vmem>>, vector<1x1x128xf32>
    %15 = vector.shape_cast %14 : vector<1x1x128xf32> to vector<1x128xf32>
    %16 = vector.broadcast %15 : vector<1x128xf32> to vector<8x128xf32>
    %17 = arith.addf %13, %16 : vector<8x128xf32>
    %18 = arith.truncf %17 : vector<8x128xf32> to vector<8x128xbf16>
    %c0_14 = arith.constant 0 : index
    %c0_15 = arith.constant 0 : index
    %19 = vector.load %arg5[%c0_14, %c0_15] : memref<8x128xbf16, #tpu.memory_space<vmem>>, vector<8x128xbf16>
    tpu.vector_store %arg5[%c0_14, %c0_15], %18 {strides = array<i32>} : memref<8x128xbf16, #tpu.memory_space<vmem>>, vector<8x128xbf16>,
    %cst_16 = arith.constant dense<0xFF800000> : vector<8xf32>
    %20 = vector.multi_reduction <maximumf>, %17, %cst_16 [1] : vector<8x128xf32> to vector<8xf32>
    %21 = vector.shape_cast %20 : vector<8xf32> to vector<8x1xf32>
    %22 = vector.broadcast %21 : vector<8x1xf32> to vector<8x128xf32>
    %23 = arith.subf %17, %22 : vector<8x128xf32>
    %24 = math.exp %23 : vector<8x128xf32>
    %cst_17 = arith.constant dense<0.000000e+00> : vector<8xf32>
    %25 = vector.multi_reduction <add>, %24, %cst_17 [1] : vector<8x128xf32> to vector<8xf32>
    %26 = vector.shape_cast %25 : vector<8xf32> to vector<8x1xf32>
    %27 = tpu.reciprocal %26 {approx = true} : vector<8x1xf32> -> vector<8x1xf32>
    %28 = vector.broadcast %27 : vector<8x1xf32> to vector<8x128xf32>
    %29 = arith.mulf %24, %28 : vector<8x128xf32>
    %30 = arith.addf %5, %29 : vector<8x128xf32>
    %cst_18 = arith.constant 9.99999974E-6 : f32
    %31 = vector.broadcast %cst_18 : f32 to vector<8x128xf32>
    %32 = arith.addf %29, %31 : vector<8x128xf32>
    %33 = math.log %32 : vector<8x128xf32>
    %34 = arith.addf %6, %33 : vector<8x128xf32>
    %35 = arith.addf %7, %23 : vector<8x128xf32>
    %36 = math.log %26 : vector<8x1xf32>
    %37 = arith.addf %8, %36 : vector<8x1xf32>
    %c1 = arith.constant 1 : index
    %c0_19 = arith.constant 0 : index
    %c0_20 = arith.constant 0 : index
    %38 = vector.load %arg2[%c1, %c0_19, %c0_20] : memref<2x8x32xbf16, #tpu.memory_space<vmem>>, vector<1x8x32xbf16>
    %39 = vector.shape_cast %38 : vector<1x8x32xbf16> to vector<8x32xbf16>
    %c1_21 = arith.constant 1 : index
    %c0_22 = arith.constant 0 : index
    %c0_23 = arith.constant 0 : index
    %40 = vector.load %arg3[%c1_21, %c0_22, %c0_23] : memref<2x32x128xbf16, #tpu.memory_space<vmem>>, vector<1x32x128xbf16>
    %41 = vector.shape_cast %40 : vector<1x32x128xbf16> to vector<32x128xbf16>
    %cst_24 = arith.constant dense<0.000000e+00> : vector<8x128xf32>
    %42 = tpu.matmul %39, %41, %cst_24 {dimension_numbers = #tpu.dot_dimension_numbers<[1], [0], [0], [1], [0, 0, 1, 1], [], []>} : vector<8x32xbf16>, vector<32x128xbf16>, vector<8x128xf32> -> vector<8x128xf32>
    %c1_25 = arith.constant 1 : index
    %c0_26 = arith.constant 0 : index
    %c0_27 = arith.constant 0 : index
    %43 = vector.load %arg4[%c1_25, %c0_26, %c0_27] : memref<2x1x128xf32, #tpu.memory_space<vmem>>, vector<1x1x128xf32>
    %44 = vector.shape_cast %43 : vector<1x1x128xf32> to vector<1x128xf32>
    %45 = vector.broadcast %44 : vector<1x128xf32> to vector<8x128xf32>
    %46 = arith.addf %42, %45 : vector<8x128xf32>
    %cst_28 = arith.constant dense<0xFF800000> : vector<8xf32>
    %47 = vector.multi_reduction <maximumf>, %46, %cst_28 [1] : vector<8x128xf32> to vector<8xf32>
    %48 = vector.shape_cast %47 : vector<8xf32> to vector<8x1xf32>
    %49 = vector.broadcast %48 : vector<8x1xf32> to vector<8x128xf32>
    %50 = arith.subf %46, %49 : vector<8x128xf32>
    %51 = math.exp %50 : vector<8x128xf32>
    %cst_29 = arith.constant dense<0.000000e+00> : vector<8xf32>
    %52 = vector.multi_reduction <add>, %51, %cst_29 [1] : vector<8x128xf32> to vector<8xf32>
    %53 = vector.shape_cast %52 : vector<8xf32> to vector<8x1xf32>
    %54 = tpu.reciprocal %53 {approx = true} : vector<8x1xf32> -> vector<8x1xf32>
    %55 = vector.broadcast %54 : vector<8x1xf32> to vector<8x128xf32>
    %56 = arith.mulf %51, %55 : vector<8x128xf32>
    %57 = arith.addf %30, %56 : vector<8x128xf32>
    %cst_30 = arith.constant 9.99999974E-6 : f32
    %58 = vector.broadcast %cst_30 : f32 to vector<8x128xf32>
    %59 = arith.addf %56, %58 : vector<8x128xf32>
    %60 = math.log %59 : vector<8x128xf32>
    %61 = arith.addf %34, %60 : vector<8x128xf32>
    %62 = arith.addf %35, %50 : vector<8x128xf32>
    %63 = math.log %53 : vector<8x1xf32>
    %64 = arith.addf %37, %63 : vector<8x1xf32>
    %65 = tpu.iota {dimensions = array<i32: 1>} : vector<8x128xi32>
    %66 = vector.broadcast %0 : vector<8x1xi32> to vector<8x128xi32>
    %67 = arith.cmpi eq, %65, %66 : vector<8x128xi32>
    %68 = vector.broadcast %2 : vector<8x1xi1> to vector<8x128xi1>
    %69 = arith.andi %67, %68 : vector<8x128xi1>
    %cst_31 = arith.constant 0.000000e+00 : f32
    %70 = vector.broadcast %cst_31 : f32 to vector<8x128xf32>
    %71 = arith.select %69, %62, %70 : vector<8x128xi1>, vector<8x128xf32>
    %cst_32 = arith.constant 0.000000e+00 : f32
    %72 = vector.broadcast %cst_32 : f32 to vector<8x1xf32>
    %73 = arith.select %2, %64, %72 : vector<8x1xi1>, vector<8x1xf32>
    %74 = vector.shape_cast %73 : vector<8x1xf32> to vector<1x8x1xf32>
    %cst_33 = arith.constant dense<0.000000e+00> : vector<1xf32>
    %75 = vector.multi_reduction <add>, %74, %cst_33 [1, 2] : vector<1x8x1xf32> to vector<1xf32>
    %76 = vector.shape_cast %75 : vector<1xf32> to vector<1x1x1xf32>
    %77 = vector.extract %76[0, 0, 0] : f32 from vector<1x1x1xf32>
    %78 = vector.shape_cast %71 : vector<8x128xf32> to vector<1x8x128xf32>
    %cst_34 = arith.constant dense<0.000000e+00> : vector<1xf32>
    %79 = vector.multi_reduction <add>, %78, %cst_34 [1, 2] : vector<1x8x128xf32> to vector<1xf32>
    %80 = vector.shape_cast %79 : vector<1xf32> to vector<1x1x1xf32>
    %81 = vector.extract %80[0, 0, 0] : f32 from vector<1x1x1xf32>
    %82 = arith.subf %77, %81 : f32
    %cst_35 = arith.constant 5.000000e-01 : f32
    %83 = vector.broadcast %cst_35 : f32 to vector<8x128xf32>
    %84 = arith.mulf %57, %83 : vector<8x128xf32>
    %cst_36 = arith.constant 9.99999974E-6 : f32
    %85 = vector.broadcast %cst_36 : f32 to vector<8x128xf32>
    %86 = arith.addf %84, %85 : vector<8x128xf32>
    %87 = math.log %86 : vector<8x128xf32>
    %cst_37 = arith.constant 2.000000e+00 : f32
    %88 = vector.broadcast %cst_37 : f32 to vector<8x128xf32>
    %89 = arith.mulf %88, %87 : vector<8x128xf32>
    %90 = arith.subf %89, %61 : vector<8x128xf32>
    %91 = arith.mulf %84, %90 : vector<8x128xf32>
    %cst_38 = arith.constant dense<0.000000e+00> : vector<8xf32>
    %92 = vector.multi_reduction <add>, %91, %cst_38 [1] : vector<8x128xf32> to vector<8xf32>
    %93 = vector.shape_cast %92 : vector<8xf32> to vector<8x1xf32>
    %cst_39 = arith.constant 0.000000e+00 : f32
    %94 = vector.broadcast %cst_39 : f32 to vector<8x1xf32>
    %95 = arith.select %2, %93, %94 : vector<8x1xi1>, vector<8x1xf32>
    %96 = vector.shape_cast %95 : vector<8x1xf32> to vector<1x8x1xf32>
    %cst_40 = arith.constant dense<0.000000e+00> : vector<1xf32>
    %97 = vector.multi_reduction <add>, %96, %cst_40 [1, 2] : vector<1x8x1xf32> to vector<1xf32>
    %98 = vector.shape_cast %97 : vector<1xf32> to vector<1x1x1xf32>
    %99 = vector.extract %98[0, 0, 0] : f32 from vector<1x1x1xf32>
    %100 = vector.shape_cast %4 : vector<8x1xf32> to vector<1x8x1xf32>
    %cst_41 = arith.constant dense<0.000000e+00> : vector<1xf32>
    %101 = vector.multi_reduction <add>, %100, %cst_41 [1, 2] : vector<1x8x1xf32> to vector<1xf32>
    %102 = vector.shape_cast %101 : vector<1xf32> to vector<1x1x1xf32>
    %103 = vector.extract %102[0, 0, 0] : f32 from vector<1x1x1xf32>
    %104 = tpu.iota {dimensions = array<i32: 0>} : vector<8x128xi32>
    %105 = tpu.iota {dimensions = array<i32: 1>} : vector<8x128xi32>
    %c0_i32 = arith.constant 0 : i32
    %106 = vector.broadcast %c0_i32 : i32 to vector<8x128xi32>
    %107 = arith.cmpi eq, %104, %106 : vector<8x128xi32>
    %c0_i32_42 = arith.constant 0 : i32
    %108 = vector.broadcast %c0_i32_42 : i32 to vector<8x128xi32>
    %109 = arith.cmpi eq, %105, %108 : vector<8x128xi32>
    %110 = arith.andi %107, %109 : vector<8x128xi1>
    %cst_43 = arith.constant 0.000000e+00 : f32
    %111 = vector.broadcast %82 : f32 to vector<8x128xf32>
    %112 = vector.broadcast %cst_43 : f32 to vector<8x128xf32>
    %113 = arith.select %110, %111, %112 : vector<8x128xi1>, vector<8x128xf32>
    %c0_i32_44 = arith.constant 0 : i32
    %114 = vector.broadcast %c0_i32_44 : i32 to vector<8x128xi32>
    %115 = arith.cmpi eq, %104, %114 : vector<8x128xi32>
    %c1_i32 = arith.constant 1 : i32
    %116 = vector.broadcast %c1_i32 : i32 to vector<8x128xi32>
    %117 = arith.cmpi eq, %105, %116 : vector<8x128xi32>
    %118 = arith.andi %115, %117 : vector<8x128xi1>
    %119 = vector.broadcast %99 : f32 to vector<8x128xf32>
    %120 = arith.select %118, %119, %113 : vector<8x128xi1>, vector<8x128xf32>
    %c0_i32_45 = arith.constant 0 : i32
    %121 = vector.broadcast %c0_i32_45 : i32 to vector<8x128xi32>
    %122 = arith.cmpi eq, %104, %121 : vector<8x128xi32>
    %c2_i32 = arith.constant 2 : i32
    %123 = vector.broadcast %c2_i32 : i32 to vector<8x128xi32>
    %124 = arith.cmpi eq, %105, %123 : vector<8x128xi32>
    %125 = arith.andi %122, %124 : vector<8x128xi1>
    %126 = vector.broadcast %103 : f32 to vector<8x128xf32>
    %127 = arith.select %125, %126, %120 : vector<8x128xi1>, vector<8x128xf32>
    %c0_46 = arith.constant 0 : index
    %c0_47 = arith.constant 0 : index
    %128 = vector.load %arg6[%c0_46, %c0_47] : memref<8x128xf32, #tpu.memory_space<vmem>>, vector<8x128xf32>
    tpu.vector_store %arg6[%c0_46, %c0_47], %127 {strides = array<i32>} : memref<8x128xf32, #tpu.memory_space<vmem>>, vector<8x128xf32>,
    return
  }
  func.func @transform_0(%arg0: i32) -> (i32, i32) {
    %c0_i32 = arith.constant 0 : i32
    %c0_i32_0 = arith.constant 0 : i32
    return %arg0, %c0_i32 : i32, i32
  }
  func.func @transform_1(%arg0: i32) -> (i32, i32, i32) {
    %c0_i32 = arith.constant 0 : i32
    %c0_i32_0 = arith.constant 0 : i32
    %c0_i32_1 = arith.constant 0 : i32
    return %c0_i32, %arg0, %c0_i32_0 : i32, i32, i32
  }
  func.func @transform_2(%arg0: i32) -> (i32, i32, i32) {
    %c0_i32 = arith.constant 0 : i32
    %c0_i32_0 = arith.constant 0 : i32
    %c0_i32_1 = arith.constant 0 : i32
    %c0_i32_2 = arith.constant 0 : i32
    return %c0_i32, %c0_i32_0, %c0_i32_1 : i32, i32, i32
  }
  func.func @transform_3(%arg0: i32) -> (i32, i32, i32) {
    %c0_i32 = arith.constant 0 : i32
    %c0_i32_0 = arith.constant 0 : i32
    %c0_i32_1 = arith.constant 0 : i32
    %c0_i32_2 = arith.constant 0 : i32
    return %c0_i32, %c0_i32_0, %c0_i32_1 : i32, i32, i32
  }
  func.func @transform_4(%arg0: i32) -> (i32, i32) {
    %c0_i32 = arith.constant 0 : i32
    %c0_i32_0 = arith.constant 0 : i32
    return %arg0, %c0_i32 : i32, i32
  }
  func.func @transform_5(%arg0: i32) -> (i32, i32) {
    %c0_i32 = arith.constant 0 : i32
    %c0_i32_0 = arith.constant 0 : i32
    return %arg0, %c0_i32 : i32, i32
  }
}

module attributes {stable_mosaic.version = 11 : i64} {
  func.func @_ensemble_kernel(%arg0: i32, %arg1: memref<8x1xi32, #tpu.memory_space<vmem>>, %arg2: memref<2x8x32xbf16, #tpu.memory_space<vmem>>, %arg3: memref<2x32x128xbf16, #tpu.memory_space<vmem>>, %arg4: memref<2x1x128xf32, #tpu.memory_space<vmem>>, %arg5: memref<8x128xbf16, #tpu.memory_space<vmem>>, %arg6: memref<8x128xf32, #tpu.memory_space<vmem>>) attributes {dimension_semantics = [#tpu.dimension_semantics<parallel>], iteration_bounds = array<i64: 2>, scalar_prefetch = 0 : i64, scratch_operands = 0 : i64, tpu.core_type = #tpu.core_type<tc>, window_params = [{transform_indices = @transform_0, window_bounds = array<i64: 8, 1>}, {transform_indices = @transform_1, window_bounds = array<i64: 2, 8, 32>}, {pipeline_mode = #tpu.pipeline_mode<synchronous>, transform_indices = @transform_2, window_bounds = array<i64: 2, 32, 128>}, {pipeline_mode = #tpu.pipeline_mode<synchronous>, transform_indices = @transform_3, window_bounds = array<i64: 2, 1, 128>}, {transform_indices = @transform_4, window_bounds = array<i64: 8, 128>}, {transform_indices = @transform_5, window_bounds = array<i64: 8, 128>}]} {
    %c0 = arith.constant 0 : index
    %c0_0 = arith.constant 0 : index
    %0 = vector.load %arg1[%c0, %c0_0] : memref<8x1xi32, #tpu.memory_space<vmem>>, vector<8x1xi32>
    %c-1_i32 = arith.constant -1 : i32
    %1 = vector.broadcast %c-1_i32 : i32 to vector<8x1xi32>
    %2 = arith.cmpi ne, %0, %1 : vector<8x1xi32>
    %3 = arith.extui %2 : vector<8x1xi1> to vector<8x1xi32>
    %4 = arith.sitofp %3 : vector<8x1xi32> to vector<8x1xf32>
    %cst = arith.constant 0.000000e+00 : f32
    %5 = vector.broadcast %cst : f32 to vector<8x128xf32>
    %cst_1 = arith.constant 0.000000e+00 : f32
    %6 = vector.broadcast %cst_1 : f32 to vector<8x128xf32>
    %cst_2 = arith.constant 0.000000e+00 : f32
    %7 = vector.broadcast %cst_2 : f32 to vector<8x128xf32>
    %cst_3 = arith.constant 0.000000e+00 : f32
    %8 = vector.broadcast %cst_3 : f32 to vector<8x1xf32>
    %c0_4 = arith.constant 0 : index
    %c0_5 = arith.constant 0 : index
    %c0_6 = arith.constant 0 : index
    %9 = vector.load %arg2[%c0_4, %c0_5, %c0_6] : memref<2x8x32xbf16, #tpu.memory_space<vmem>>, vector<1x8x32xbf16>
    %10 = vector.shape_cast %9 : vector<1x8x32xbf16> to vector<8x32xbf16>
    %c0_7 = arith.constant 0 : index
    %c0_8 = arith.constant 0 : index
    %c0_9 = arith.constant 0 : index
    %11 = vector.load %arg3[%c0_7, %c0_8, %c0_9] : memref<2x32x128xbf16, #tpu.memory_space<vmem>>, vector<1x32x128xbf16>
    %12 = vector.shape_cast %11 : vector<1x32x128xbf16> to vector<32x128xbf16>
    %cst_10 = arith.constant dense<0.000000e+00> : vector<8x128xf32>
    %13 = tpu.matmul %10, %12, %cst_10 {dimension_numbers = #tpu.dot_dimension_numbers<[1], [0], [0], [1], [0, 0, 1, 1], [], []>} : vector<8x32xbf16>, vector<32x128xbf16>, vector<8x128xf32> -> vector<8x128xf32>
    %c0_11 = arith.constant 0 : index
    %c0_12 = arith.constant 0 : index
    %c0_13 = arith.constant 0 : index
    %14 = vector.load %arg4[%c0_11, %c0_12, %c0_13] : memref<2x1x128xf32, #tpu.memory_space<vmem>>, vector<1x1x128xf32>
    %15 = vector.shape_cast %14 : vector<1x1x128xf32> to vector<1x128xf32>
    %16 = vector.broadcast %15 : vector<1x128xf32> to vector<8x128xf32>
    %17 = arith.addf %13, %16 : vector<8x128xf32>
    %18 = arith.truncf %17 : vector<8x128xf32> to vector<8x128xbf16>
    %c0_14 = arith.constant 0 : index
    %c0_15 = arith.constant 0 : index
    %19 = vector.load %arg5[%c0_14, %c0_15] : memref<8x128xbf16, #tpu.memory_space<vmem>>, vector<8x128xbf16>
    tpu.vector_store %arg5[%c0_14, %c0_15], %18 {strides = array<i32>} : memref<8x128xbf16, #tpu.memory_space<vmem>>, vector<8x128xbf16>,
    %cst_16 = arith.constant dense<0xFF800000> : vector<8xf32>
    %20 = vector.multi_reduction <maximumf>, %17, %cst_16 [1] : vector<8x128xf32> to vector<8xf32>
    %21 = vector.shape_cast %20 : vector<8xf32> to vector<8x1xf32>
    %22 = vector.broadcast %21 : vector<8x1xf32> to vector<8x128xf32>
    %23 = arith.subf %17, %22 : vector<8x128xf32>
    %24 = math.exp %23 : vector<8x128xf32>
    %cst_17 = arith.constant dense<0.000000e+00> : vector<8xf32>
    %25 = vector.multi_reduction <add>, %24, %cst_17 [1] : vector<8x128xf32> to vector<8xf32>
    %26 = vector.shape_cast %25 : vector<8xf32> to vector<8x1xf32>
    %27 = tpu.reciprocal %26 {approx = true} : vector<8x1xf32> -> vector<8x1xf32>
    %28 = vector.broadcast %27 : vector<8x1xf32> to vector<8x128xf32>
    %29 = arith.mulf %24, %28 : vector<8x128xf32>
    %30 = arith.addf %5, %29 : vector<8x128xf32>
    %cst_18 = arith.constant 9.99999974E-6 : f32
    %31 = vector.broadcast %cst_18 : f32 to vector<8x128xf32>
    %32 = arith.addf %29, %31 : vector<8x128xf32>
    %33 = math.log %32 : vector<8x128xf32>
    %34 = arith.addf %6, %33 : vector<8x128xf32>
    %35 = arith.addf %7, %23 : vector<8x128xf32>
    %36 = math.log %26 : vector<8x1xf32>
    %37 = arith.addf %8, %36 : vector<8x1xf32>
    %c1 = arith.constant 1 : index
    %c0_19 = arith.constant 0 : index
    %c0_20 = arith.constant 0 : index
    %38 = vector.load %arg2[%c1, %c0_19, %c0_20] : memref<2x8x32xbf16, #tpu.memory_space<vmem>>, vector<1x8x32xbf16>
    %39 = vector.shape_cast %38 : vector<1x8x32xbf16> to vector<8x32xbf16>
    %c1_21 = arith.constant 1 : index
    %c0_22 = arith.constant 0 : index
    %c0_23 = arith.constant 0 : index
    %40 = vector.load %arg3[%c1_21, %c0_22, %c0_23] : memref<2x32x128xbf16, #tpu.memory_space<vmem>>, vector<1x32x128xbf16>
    %41 = vector.shape_cast %40 : vector<1x32x128xbf16> to vector<32x128xbf16>
    %cst_24 = arith.constant dense<0.000000e+00> : vector<8x128xf32>
    %42 = tpu.matmul %39, %41, %cst_24 {dimension_numbers = #tpu.dot_dimension_numbers<[1], [0], [0], [1], [0, 0, 1, 1], [], []>} : vector<8x32xbf16>, vector<32x128xbf16>, vector<8x128xf32> -> vector<8x128xf32>
    %c1_25 = arith.constant 1 : index
    %c0_26 = arith.constant 0 : index
    %c0_27 = arith.constant 0 : index
    %43 = vector.load %arg4[%c1_25, %c0_26, %c0_27] : memref<2x1x128xf32, #tpu.memory_space<vmem>>, vector<1x1x128xf32>
    %44 = vector.shape_cast %43 : vector<1x1x128xf32> to vector<1x128xf32>
    %45 = vector.broadcast %44 : vector<1x128xf32> to vector<8x128xf32>
    %46 = arith.addf %42, %45 : vector<8x128xf32>
    %cst_28 = arith.constant dense<0xFF800000> : vector<8xf32>
    %47 = vector.multi_reduction <maximumf>, %46, %cst_28 [1] : vector<8x128xf32> to vector<8xf32>
    %48 = vector.shape_cast %47 : vector<8xf32> to vector<8x1xf32>
    %49 = vector.broadcast %48 : vector<8x1xf32> to vector<8x128xf32>
    %50 = arith.subf %46, %49 : vector<8x128xf32>
    %51 = math.exp %50 : vector<8x128xf32>
    %cst_29 = arith.constant dense<0.000000e+00> : vector<8xf32>
    %52 = vector.multi_reduction <add>, %51, %cst_29 [1] : vector<8x128xf32> to vector<8xf32>
    %53 = vector.shape_cast %52 : vector<8xf32> to vector<8x1xf32>
    %54 = tpu.reciprocal %53 {approx = true} : vector<8x1xf32> -> vector<8x1xf32>
    %55 = vector.broadcast %54 : vector<8x1xf32> to vector<8x128xf32>
    %56 = arith.mulf %51, %55 : vector<8x128xf32>
    %57 = arith.addf %30, %56 : vector<8x128xf32>
    %cst_30 = arith.constant 9.99999974E-6 : f32
    %58 = vector.broadcast %cst_30 : f32 to vector<8x128xf32>
    %59 = arith.addf %56, %58 : vector<8x128xf32>
    %60 = math.log %59 : vector<8x128xf32>
    %61 = arith.addf %34, %60 : vector<8x128xf32>
    %62 = arith.addf %35, %50 : vector<8x128xf32>
    %63 = math.log %53 : vector<8x1xf32>
    %64 = arith.addf %37, %63 : vector<8x1xf32>
    %65 = tpu.iota {dimensions = array<i32: 1>} : vector<8x128xi32>
    %66 = vector.broadcast %0 : vector<8x1xi32> to vector<8x128xi32>
    %67 = arith.cmpi eq, %65, %66 : vector<8x128xi32>
    %68 = vector.broadcast %2 : vector<8x1xi1> to vector<8x128xi1>
    %69 = arith.andi %67, %68 : vector<8x128xi1>
    %cst_31 = arith.constant 0.000000e+00 : f32
    %70 = vector.broadcast %cst_31 : f32 to vector<8x128xf32>
    %71 = arith.select %69, %62, %70 : vector<8x128xi1>, vector<8x128xf32>
    %cst_32 = arith.constant 0.000000e+00 : f32
    %72 = vector.broadcast %cst_32 : f32 to vector<8x1xf32>
    %73 = arith.select %2, %64, %72 : vector<8x1xi1>, vector<8x1xf32>
    %74 = vector.shape_cast %73 : vector<8x1xf32> to vector<1x8x1xf32>
    %cst_33 = arith.constant dense<0.000000e+00> : vector<1xf32>
    %75 = vector.multi_reduction <add>, %74, %cst_33 [1, 2] : vector<1x8x1xf32> to vector<1xf32>
    %76 = vector.shape_cast %75 : vector<1xf32> to vector<1x1x1xf32>
    %77 = vector.extract %76[0, 0, 0] : f32 from vector<1x1x1xf32>
    %78 = vector.shape_cast %71 : vector<8x128xf32> to vector<1x8x128xf32>
    %cst_34 = arith.constant dense<0.000000e+00> : vector<1xf32>
    %79 = vector.multi_reduction <add>, %78, %cst_34 [1, 2] : vector<1x8x128xf32> to vector<1xf32>
    %80 = vector.shape_cast %79 : vector<1xf32> to vector<1x1x1xf32>
    %81 = vector.extract %80[0, 0, 0] : f32 from vector<1x1x1xf32>
    %82 = arith.subf %77, %81 : f32
    %cst_35 = arith.constant 5.000000e-01 : f32
    %83 = vector.broadcast %cst_35 : f32 to vector<8x128xf32>
    %84 = arith.mulf %57, %83 : vector<8x128xf32>
    %cst_36 = arith.constant 9.99999974E-6 : f32
    %85 = vector.broadcast %cst_36 : f32 to vector<8x128xf32>
    %86 = arith.addf %84, %85 : vector<8x128xf32>
    %87 = math.log %86 : vector<8x128xf32>
    %cst_37 = arith.constant 2.000000e+00 : f32
    %88 = vector.broadcast %cst_37 : f32 to vector<8x128xf32>
    %89 = arith.mulf %88, %87 : vector<8x128xf32>
    %90 = arith.subf %89, %61 : vector<8x128xf32>
    %91 = arith.mulf %84, %90 : vector<8x128xf32>
    %cst_38 = arith.constant dense<0.000000e+00> : vector<8xf32>
    %92 = vector.multi_reduction <add>, %91, %cst_38 [1] : vector<8x128xf32> to vector<8xf32>
    %93 = vector.shape_cast %92 : vector<8xf32> to vector<8x1xf32>
    %cst_39 = arith.constant 0.000000e+00 : f32
    %94 = vector.broadcast %cst_39 : f32 to vector<8x1xf32>
    %95 = arith.select %2, %93, %94 : vector<8x1xi1>, vector<8x1xf32>
    %96 = vector.shape_cast %95 : vector<8x1xf32> to vector<1x8x1xf32>
    %cst_40 = arith.constant dense<0.000000e+00> : vector<1xf32>
    %97 = vector.multi_reduction <add>, %96, %cst_40 [1, 2] : vector<1x8x1xf32> to vector<1xf32>
    %98 = vector.shape_cast %97 : vector<1xf32> to vector<1x1x1xf32>
    %99 = vector.extract %98[0, 0, 0] : f32 from vector<1x1x1xf32>
    %100 = vector.shape_cast %4 : vector<8x1xf32> to vector<1x8x1xf32>
    %cst_41 = arith.constant dense<0.000000e+00> : vector<1xf32>
    %101 = vector.multi_reduction <add>, %100, %cst_41 [1, 2] : vector<1x8x1xf32> to vector<1xf32>
    %102 = vector.shape_cast %101 : vector<1xf32> to vector<1x1x1xf32>
    %103 = vector.extract %102[0, 0, 0] : f32 from vector<1x1x1xf32>
    %104 = tpu.iota {dimensions = array<i32: 0>} : vector<8x128xi32>
    %105 = tpu.iota {dimensions = array<i32: 1>} : vector<8x128xi32>
    %c0_i32 = arith.constant 0 : i32
    %106 = vector.broadcast %c0_i32 : i32 to vector<8x128xi32>
    %107 = arith.cmpi eq, %104, %106 : vector<8x128xi32>
    %c0_i32_42 = arith.constant 0 : i32
    %108 = vector.broadcast %c0_i32_42 : i32 to vector<8x128xi32>
    %109 = arith.cmpi eq, %105, %108 : vector<8x128xi32>
    %110 = arith.andi %107, %109 : vector<8x128xi1>
    %cst_43 = arith.constant 0.000000e+00 : f32
    %111 = vector.broadcast %82 : f32 to vector<8x128xf32>
    %112 = vector.broadcast %cst_43 : f32 to vector<8x128xf32>
    %113 = arith.select %110, %111, %112 : vector<8x128xi1>, vector<8x128xf32>
    %c0_i32_44 = arith.constant 0 : i32
    %114 = vector.broadcast %c0_i32_44 : i32 to vector<8x128xi32>
    %115 = arith.cmpi eq, %104, %114 : vector<8x128xi32>
    %c1_i32 = arith.constant 1 : i32
    %116 = vector.broadcast %c1_i32 : i32 to vector<8x128xi32>
    %117 = arith.cmpi eq, %105, %116 : vector<8x128xi32>
    %118 = arith.andi %115, %117 : vector<8x128xi1>
    %119 = vector.broadcast %99 : f32 to vector<8x128xf32>
    %120 = arith.select %118, %119, %113 : vector<8x128xi1>, vector<8x128xf32>
    %c0_i32_45 = arith.constant 0 : i32
    %121 = vector.broadcast %c0_i32_45 : i32 to vector<8x128xi32>
    %122 = arith.cmpi eq, %104, %121 : vector<8x128xi32>
    %c2_i32 = arith.constant 2 : i32
    %123 = vector.broadcast %c2_i32 : i32 to vector<8x128xi32>
    %124 = arith.cmpi eq, %105, %123 : vector<8x128xi32>
    %125 = arith.andi %122, %124 : vector<8x128xi1>
    %126 = vector.broadcast %103 : f32 to vector<8x128xf32>
    %127 = arith.select %125, %126, %120 : vector<8x128xi1>, vector<8x128xf32>
    %c0_46 = arith.constant 0 : index
    %c0_47 = arith.constant 0 : index
    %128 = vector.load %arg6[%c0_46, %c0_47] : memref<8x128xf32, #tpu.memory_space<vmem>>, vector<8x128xf32>
    tpu.vector_store %arg6[%c0_46, %c0_47], %127 {strides = array<i32>} : memref<8x128xf32, #tpu.memory_space<vmem>>, vector<8x128xf32>,
    return
  }
  func.func @transform_0(%arg0: i32) -> (i32, i32) {
    %c0_i32 = arith.constant 0 : i32
    %c0_i32_0 = arith.constant 0 : i32
    return %arg0, %c0_i32 : i32, i32
  }
  func.func @transform_1(%arg0: i32) -> (i32, i32, i32) {
    %c0_i32 = arith.constant 0 : i32
    %c0_i32_0 = arith.constant 0 : i32
    %c0_i32_1 = arith.constant 0 : i32
    return %c0_i32, %arg0, %c0_i32_0 : i32, i32, i32
  }
  func.func @transform_2(%arg0: i32) -> (i32, i32, i32) {
    %c0_i32 = arith.constant 0 : i32
    %c0_i32_0 = arith.constant 0 : i32
    %c0_i32_1 = arith.constant 0 : i32
    %c0_i32_2 = arith.constant 0 : i32
    return %c0_i32, %c0_i32_0, %c0_i32_1 : i32, i32, i32
  }
  func.func @transform_3(%arg0: i32) -> (i32, i32, i32) {
    %c0_i32 = arith.constant 0 : i32
    %c0_i32_0 = arith.constant 0 : i32
    %c0_i32_1 = arith.constant 0 : i32
    %c0_i32_2 = arith.constant 0 : i32
    return %c0_i32, %c0_i32_0, %c0_i32_1 : i32, i32, i32
  }
  func.func @transform_4(%arg0: i32) -> (i32, i32) {
    %c0_i32 = arith.constant 0 : i32
    %c0_i32_0 = arith.constant 0 : i32
    return %arg0, %c0_i32 : i32, i32
  }
  func.func @transform_5(%arg0: i32) -> (i32, i32) {
    %c0_i32 = arith.constant 0 : i32
    %c0_i32_0 = arith.constant 0 : i32
    return %arg0, %c0_i32 : i32, i32
  }
}

</mosaic_0001>

<bundles_post_ra>
// kernel: tpu_custom_call.1
= control target key start
LH: loop header
LB: loop body
LE: loop exit
PB: predicated region body
PF: predicated region fallthrough
CT: control target
= control target key end

     0   :  { %11 = vsyncpa [#allocation4], 0  ;;  %s1221_s0 = inlined_call_operand.vmem [shape: s32[16,1], index: 0, kind: input, shape index: {}]   ;;  %s1222_s1 = inlined_call_operand.vmem [shape: bf16[2,16,32], index: 1, kind: input, shape index: {}]   ;;  %s1223_s2 = inlined_call_operand.hbm [shape: bf16[2,32,128], index: 2, kind: input, shape index: {}]   ;;  %s1224_s3 = inlined_call_operand.vmem [shape: f32[2,1,128], index: 3, kind: input, shape index: {}]   ;;  %s1225_s4 = inlined_call_operand.hbm [shape: bf16[16,128], index: 4, kind: output, shape index: {0}]   ;;  %s1226_s5 = inlined_call_operand.hbm [shape: f32[16,128], index: 5, kind: output, shape index: {1}]  }
   0x1   :  { %12 = vsyncpa [#allocation5], 0 }
   0x2   :  { %14 = vsyncpa [#allocation5 + $0x1], 0 }
   0x3   :  { %15 = vsyncpa [#allocation8], 0 }
   0x4   :  { %17 = vsyncpa [#allocation8 + $0x1], 0  ;;  %s1030_s18 = smov 0   ;;  %s1032_s19 = smov 0  }
   0x5   :  { %s1034_s20 = smov 0   ;;  %s1036_s21 = smov 0  }
   0x6 LB: > { %s1051_s22 = sadd.s32 4294967295, %s990_s21   ;;  %s727_s23 = sadd.s32 4294967294, %s990_s21   ;;  %s990_s21 = sphi %s1036_s21, %s1237_s21   ;;  %s986_s20 = sphi %s1034_s20, %s1236_s20   ;;  %s982_s19 = sphi %s1032_s19, %s1235_s19   ;;  %s978_s18 = sphi %s1030_s18, %s1234_s18  }
   0x7   : > { %s1055_s24 = sadd.s32 1, %s990_s21   ;;  %s56_s25 = sadd.s32 1, %s986_s20 }
   0x8   : > { %s53_s26 = ssub.s32 %s990_s21, %s1055_s24  ;;  %p63_p0 = scmp.ne.s32.totalorder %s986_s20, %s982_s19 }
   0x9   : > { %p54_p1 = scmp.eq.s32.totalorder %s53_s26, 0  ;;  %p64_p2 = scmp.eq.s32.totalorder %s990_s21, 0 }
   0xa   : > { %p135_p3 = scmp.eq.s32.totalorder %s1051_s22, 1  ;;  %p140_p4 = scmp.ne.s32.totalorder %s982_s19, %s978_s18 }
   0xb   : > { %s1067_s27 = scalar_select %p54_p1, %s986_s20, %s56_s25  }
   0xc   : > { %p1069_p5 = por %p64_p2, %p63_p0  ;;  %p1073_p6 = por %p135_p3, %p63_p0 }
   0xd   : > { %p141_p7 = scmp.eq.s32.totalorder %s727_s23, 1  ;;  %p728_p8 = scmp.ge.s32.totalorder %s990_s21, 1 }
   0xe   : > { %s1229_s29 = scalar_select %p1073_p6, 1, 0 }
   0xf   : > { %p174_p9 = scmp.lt.s32.totalorder %s990_s21, 3  ;;  %p1079_p10 = por %p141_p7, %p140_p4 }
  0x10   : > { %p805_p11 = scmp.eq.s32.totalorder %s1051_s22, 0  ;;  %s992_s7 = smov [#allocation3]  }
  0x11   : > { %s1230_s30 = scalar_select %p1079_p10, 1, 0 }
  0x12   : > { %p1084_p12 = pnand %p728_p8, %p174_p9  ;;  %s186_s8 = sshll.u32 %s992_s7, 4  ;;  %s187_s8 = int_to_ptr.vmem [resolvable:$true] %s186_s8 }
  0x13   : > { %s881_s9 = scalar_lea.vmem %s187_s8, 512  ;;  %p889_p7 = scmp.lt.s32.totalorder %s187_s8, %s187_s8 }
  0x14   : > { %p794_p13 = pneg %p1084_p12  ;;  %p882_p2 = scmp.ne.s32.totalorder %s187_s8, %s881_s9 }
  0x15   : > { %p890_p10 = scmp.lt.s32.totalorder %s881_s9, %s881_s9 }
  0x16   : > { %p795_p0 = pnand %p805_p11, %p794_p13 }
  0x17   : > { %p891_p6 = por %p890_p10, %p889_p7 }
  0x18   : > { %p872_p1 = pneg %p795_p0 }
  0x1a   : > { %p884_p3 = pnand %p882_p2, %p872_p1 }
  0x1c   : > { %p885_p4 = pneg %p884_p3 }
  0x1e   : > { %p892_p8 = pnand %p891_p6, %p885_p4 }
  0x20   : > { %895 = shalt.err (!%p892_p8)
}
  0x21   : > { %s993_s10 = smov 64   ;;  %s994_s11 = smov 4  }
  0x22   : > { %797 = dma.hbm_to_vmem [thread:$0]  (!%p795_p0), %s1223_s2, 512, %s187_s8, [#allocation4], %s993_s10, %s993_s10, %s994_s11  }
  0x23   : > { %p730_p9 = scmp.ge.s32.totalorder %s990_s21, 2 }
  0x25   : > { %199 = sbr.rel (%p730_p9) target bundleno = 47 (0x2f), region = 24 }
  0x2a   : > { %209 = sbr.rel (!%p1069_p5) target bundleno = 47 (0x2f), region = 32  ;;  %s211_s14 = sand.u32 (%p1069_p5), 1, %s986_s20  }
  0x2b   : > { %s732_s15 = sshll.u32 (%p1069_p5), %s990_s21, 2  ;;  %s731_s16 = sshll.u32 (%p1069_p5), %s211_s14, 3 }
  0x2c   : > { %s215_s25 = scalar_lea.vmem (%p1069_p5), %s1222_s1, %s732_s15  ;;  %s213_s26 = scalar_lea.vmem (%p1069_p5), [#allocation2], %s731_s16 }
  0x2d   : > { %v232_v0 = vld [vmem:[%s215_s25] sm:$0xf] (%p1069_p5)  ;;  %v234_v1 = vld [vmem:[%s215_s25 + $0x8] sm:$0xf] (%p1069_p5) }
  0x2e   : > { %233 = vst [vmem:[%s213_s26] sm:$0xf] (%p1069_p5), %v232_v0  ;;  %235 = vst [vmem:[%s213_s26 + $0x4] sm:$0xf] (%p1069_p5), %v234_v1 }
  0x2f PF: > { %266 = sbr.rel (%p1084_p12) target bundleno = 968 (0x3c8), region = 73  ;;  %s1108_s28 = sand.u32 (!%p1084_p12), 1, %s982_s19  }
  0x30   : > { %s734_s7 = sshll.u32 (!%p1084_p12), %s1108_s28, 3 }
  0x31   : > { %s271_s8 = scalar_lea.vmem (!%p1084_p12), [#allocation2], %s734_s7 }
  0x34   : > { %965 = dma.done.wait (%p805_p11), [#allocation4], 512  }
  0x35   : > { %967 = vsyncadd (%p805_p11), [#allocation4], 4294966784  ;;  %v995_v2 = vmov 0.0   ;;  %vm996_vm0 = vmmov 0   ;;  %v848_v3 = vld [vmem:[#allocation3 + $0x8] sm:$0xff]   ;;  %v849_v4 = vld [vmem:[#allocation3 + $0x18] sm:$0xff]  }
  0x36   : > { %762 = vmatprep.subr.bf16.mxu0 %v995_v2  ;;  %770 = vmatprep.subr.bf16.mxu1 %v995_v2  ;;  %v850_v5 = vld [vmem:[#allocation3] sm:$0xff]   ;;  %v851_v6 = vld [vmem:[#allocation3 + $0x10] sm:$0xff]   ;;  %vm342_vm1 = vcmask 261120   ;;  %s736_s10 = sshll.u32 %s1108_s28, 2  ;;  %v997_v22 = vmov 0   ;;  %p309_p5 = scmp.lt.s32.totalorder %s1051_s22, 1 }
  0x37   : > { %766 = vmatprep.mubr.msk.bf16.mxu0 %vm996_vm0, %v995_v2  ;;  %774 = vmatprep.mubr.msk.bf16.mxu1 %vm996_vm0, %v995_v2  ;;  %v318_v7 = vld [vmem:[%s271_s8] sm:$0xf]  ;;  %v744_v8 = vld [vmem:[%s271_s8 + $0x4] sm:$0xf]  ;;  %s1130_s13 = scalar_lea.vmem [#allocation6], %s736_s10  ;;  %vm507_vm3 = vcmask 7168  }
  0x38   : > { %763 = vmatpush3.bf16.msra.mxu0 %v848_v3  ;;  %771 = vmatpush3.bf16.msra.mxu1 %v849_v4  ;;  %v740_v9 = vld [vmem:[%s1224_s3] ss:$0 sm:$0xff]  ;;  %v746_v11 = vld [vmem:[%s1224_s3 + $0x1] ss:$0 sm:$0xff]  ;;  %s310_s14 = scalar_select %p309_p5, %s1051_s22, 1 }
  0x39   : > { %764 = vmatprep.subr.bf16.mxu0 %v995_v2  ;;  %772 = vmatprep.subr.bf16.mxu1 %v995_v2  ;;  %s752_s25 = sshll.u32 %s1051_s22, 6  ;;  %s593_s9 = sshll.u32 %s1130_s13, 4  ;;  %s594_s9 = int_to_ptr.vmem [resolvable:$true] %s593_s9 }
  0x3a   : > { %846 = vset.pattern.permute.xlu1 %v997_v22  ;;  %847 = vset.pattern.permute.xlu0 %v997_v22  ;;  %s738_s15 = sshll.u32 %s310_s14, 3  ;;  %s591_s6 = scalar_lea.hbm %s1225_s4, %s752_s25 }
  0x3b   : > { %s312_s23 = scalar_lea.vmem %s1221_s0, %s738_s15  ;;  %s575_s10 = scalar_lea.sflag [#allocation5], %s1108_s28 }
  0x3c   : > { %765 = vmatpush3.bf16.msra.mxu0 %v850_v5  ;;  %773 = vmatpush3.bf16.msra.mxu1 %v851_v6  ;;  %v314_v32 = vld [vmem:[%s312_s23] sm:$0xff]  ;;  %s896_s11 = scalar_lea.vmem %s594_s9, 64  ;;  %p1232_p10 = scmp.ne.s32.totalorder %s1229_s29, 0 }
  0x3d   : > { %vm315_vm2 = vcmp.ne.s32.totalorder %v314_v32, 4294967295  ;;  %p897_p6 = scmp.ne.s32.totalorder %s594_s9, %s896_s11  ;;  %s998_s12 = smov [#allocation6]  }
  0x3e   : > { %v316_v61 = vsel %vm315_vm2, 1, %v997_v22  ;;  %s900_s14 = sshll.u32 %s998_s12, 4  ;;  %s901_s14 = int_to_ptr.vmem [resolvable:$false] %s900_s14 }
  0x3f   : > { %767 = vmatmul.mubr.msk.bf16.vlgmr.msra.gmra.mxu0 %vm342_vm1, %v318_v7  ;;  %775 = vmatmul.mubr.msk.bf16.vlgmr.msra.gmra.mxu1 %vm342_vm1, %v744_v8  ;;  %v494_v7 = vlaneseq  ;;  %p898_p11 = pnand %p897_p6, %p1232_p10  ;;  %s902_s15 = scalar_lea.vmem %s901_s14, 128 }
  0x40   : > { %p903_p13 = scmp.lt.s32.totalorder %s594_s9, %s901_s14  ;;  %p904_p0 = scmp.lt.s32.totalorder %s902_s15, %s896_s11 }
  0x41   : > { %p899_p12 = pneg %p898_p11 }
  0x42   : > { %p905_p1 = por %p904_p0, %p903_p13 }
  0x44   : > { %p906_p2 = pnand %p905_p1, %p899_p12 }
  0xff   : > { %v380_v10 = vpop.f32.mrf.mxu0  ;;  %v470_v13 = vpop.f32.mrf.mxu1 }
 0x100   : > { %v381_v12 = vadd.f32 %v740_v9, %v380_v10  ;;  %v471_v16 = vadd.f32 %v746_v11, %v470_v13  ;;  %v739_v10 = vsel %vm315_vm2, 1.0, %v995_v2 }
 0x101   : > { %v768_v14 = vpop.f32.mrf.mxu0  ;;  %v776_v17 = vpop.f32.mrf.mxu1  ;;  %v548_v13 = vsel %vm507_vm3, %v739_v10, 0.0 }
 0x102   : > { %v386_v15 = vpack.c.bf16 %v381_v12, %v381_v12  ;;  %388 = vmax.xlane.f32.xlu0 %v381_v12 }
 0x103   : > { %v383_v18 = vpop.f32.mrf.mxu0  ;;  %v473_v19 = vpop.f32.mrf.mxu1 }
 0x104   : > { %387 = vst [vmem:[%s1130_s13] sm:$0xf] %v386_v15 }
 0x105   : > { %v769_v20 = vpop.f32.mrf.mxu0  ;;  %v777_v21 = vpop.f32.mrf.mxu1 }
 0x106   : > { %476 = vmax.xlane.f32.xlu0 %v471_v16 }
 0x18b   : > { %v389_v23 = vpop.xlane.xlu0 %388 }
 0x18c   : > { %v390_v24 = vsub.f32 %v381_v12, %v389_v23  ;;  %v1148_v12 = vand.u32 127, %v494_v7 }
 0x18e   : > { %v391_v25 = vmul.f32 1.442695, %v390_v24 }
 0x18f   : > { %v477_v26 = vpop.xlane.xlu0 %476 }
 0x190   : > { %852 = vpow2.f32 %v391_v25  ;;  %v478_v27 = vsub.f32 %v471_v16, %v477_v26 }
 0x192   : > { %v479_v28 = vmul.f32 1.442695, %v478_v27  ;;  %v1133_v29 = vadd.f32 %v478_v27, %v390_v24 }
 0x194   : > { %854 = vpow2.f32 %v479_v28 }
 0x19d   : > { %v853_v30 = vpop.eup %852 }
 0x19e   : > { %393 = vadd.xlane.f32.xlu1 %v853_v30 }
 0x1a1   : > { %v855_v31 = vpop.eup %854 }
 0x1a2   : > { %481 = vadd.xlane.f32.xlu1 %v855_v31 }
 0x1b3   : > { %497 = vperm.xlu1 %846, %v314_v32  }
 0x227   : > { %v394_v33 = vpop.xlane.xlu1 %393 }
 0x228   : > { %856 = vrcp.f32 %v394_v33 }
 0x229   : > { %858 = vlog2.f32 %v394_v33 }
 0x22b   : > { %v482_v34 = vpop.xlane.xlu1 %481 }
 0x22c   : > { %860 = vrcp.f32 %v482_v34 }
 0x22d   : > { %862 = vlog2.f32 %v482_v34 }
 0x22f   : > { %v498_v62 = vpop.permute.xlu1 %497 }
 0x230   : > { %vm499_vm4 = vcmp.eq.s32.totalorder %v1148_v12, %v498_v62 }
 0x235   : > { %v857_v35 = vpop.eup %856 }
 0x236   : > { %v859_v36 = vpop.eup %858  ;;  %v396_v37 = vmul.f32 %v857_v35, %v853_v30 }
 0x237   : > { %v404_v41 = vmul.f32 0.6931472, %v859_v36 }
 0x238   : > { %v398_v43 = vadd.f32 1e-05, %v396_v37 }
 0x239   : > { %v861_v38 = vpop.eup %860 }
 0x23a   : > { %v863_v39 = vpop.eup %862  ;;  %v484_v40 = vmul.f32 %v861_v38, %v855_v31 }
 0x23b   : > { %v492_v42 = vmul.f32 0.6931472, %v863_v39 }
 0x23c   : > { %v485_v44 = vadd.f32 %v484_v40, %v396_v37  ;;  %v486_v45 = vadd.f32 1e-05, %v484_v40 }
 0x23d   : > { %v493_v46 = vadd.f32 %v492_v42, %v404_v41 }
 0x23e   : > { %864 = vlog2.f32 %v486_v45  ;;  %v528_v47 = vmul.f32 0.5, %v485_v44 }
 0x23f   : > { %v506_v48 = vsel %vm315_vm2, %v493_v46, 0.0  ;;  %866 = vlog2.f32 %v398_v43 }
 0x240   : > { %v508_v49 = vsel %vm507_vm3, %v506_v48, 0.0  ;;  %v529_v50 = vadd.f32 1e-05, %v528_v47 }
 0x241   : > { %509 = vadd.xlane.f32.xlu1 %v508_v49 }
 0x242   : > { %868 = vlog2.f32 %v529_v50 }
 0x24b   : > { %v865_v51 = vpop.eup %864 }
 0x24c   : > { %v867_v52 = vpop.eup %866  ;;  %v488_v53 = vmul.f32 0.6931472, %v865_v51 }
 0x24d   : > { %v400_v55 = vmul.f32 0.6931472, %v867_v52 }
 0x24f   : > { %v869_v54 = vpop.eup %868  ;;  %v489_v57 = vadd.f32 %v488_v53, %v400_v55 }
 0x250   : > { %v531_v56 = vmul.f32 0.6931472, %v869_v54 }
 0x252   : > { %v532_v58 = vmul.f32 2.0, %v531_v56 }
 0x254   : > { %v533_v59 = vsub.f32 %v532_v58, %v489_v57 }
 0x256   : > { %v534_v60 = vmul.f32 %v533_v59, %v528_v47 }
 0x258   : > { %535 = vadd.xlane.f32.xlu0 %v534_v60 }
 0x26e   : > { %501 = vperm.xlu0 %847, %v316_v61  }
 0x2ca   : > { %v510_v63 = vpop.xlane.xlu1 %509 }
 0x2cb   : > { %v511_v0 = vrot.slane %v510_v63, 4 }
 0x2cd   : > { %v512_v1 = vadd.f32 %v511_v0, %v510_v63 }
 0x2cf   : > { %v513_v3 = vrot.slane %v512_v1, 2 }
 0x2d1   : > { %v514_v4 = vadd.f32 %v513_v3, %v512_v1 }
 0x2d3   : > { %v515_v5 = vrot.slane %v514_v4, 1 }
 0x2d5   : > { %v516_v6 = vadd.f32 %v515_v5, %v514_v4 }
 0x2d7   : > { %778 = vpush %v516_v6 }
 0x2e1   : > { %v536_v8 = vpop.xlane.xlu0 %535 }
 0x2e2   : > { %v537_v9 = vsel %vm315_vm2, %v536_v8, 0.0 }
 0x2e3   : > { %v538_v11 = vsel %vm507_vm3, %v537_v9, 0.0 }
 0x2e4   : > { %539 = vadd.xlane.f32.xlu1 %v538_v11 }
 0x2e8   : > { %549 = vadd.xlane.f32.xlu1 %v548_v13 }
 0x2e9   : > { %v502_v14 = vpop.permute.xlu0 %501 }
 0x2ea   : > { %vm503_vm5 = vcmp.eq.s32.totalorder %v502_v14, 1 }
 0x2eb   : > { %vm504_vm6 = vmand %vm499_vm4, %vm503_vm5 }
 0x2ec   : > { %v505_v15 = vsel %vm504_vm6, %v1133_v29, 0.0 }
 0x2ed   : > { %518 = vadd.xlane.f32.xlu0 %v505_v15 }
 0x2ee   : > { %909 = shalt.err (!%p906_p2)
}
 0x2ef   : > { %s910_s16 = scalar_lea.hbm %s591_s6, 64  ;;  %s914_s23 = scalar_lea.hbm %s1225_s4, 128 }
 0x2f0   : > { %p911_p3 = scmp.ne.s32.totalorder %s591_s6, %s910_s16  ;;  %p915_p8 = scmp.lt.s32.totalorder %s591_s6, %s1225_s4 }
 0x2f1   : > { %p916_p5 = scmp.lt.s32.totalorder %s914_s23, %s910_s16 }
 0x2f2   : > { %p912_p4 = pnand %p911_p3, %p1232_p10 }
 0x2f3   : > { %p917_p6 = por %p916_p5, %p915_p8 }
 0x2f4   : > { %p913_p7 = pneg %p912_p4 }
 0x2f6   : > { %p918_p11 = pnand %p917_p6, %p913_p7 }
 0x2f8   : > { %921 = shalt.err (!%p918_p11)
}
 0x2f9   : > { %790 = dma.vmem_to_hbm [thread:$0]  (%p1232_p10), %s594_s9, 64, %s591_s6, %s575_s10   ;;  %v559_v36 = vshrl.u32 %v494_v7, 7  ;;  %vm561_vm8 = vcmp.eq.s32.totalorder %v1148_v12, 0  ;;  %vm565_vm9 = vcmp.eq.s32.totalorder %v1148_v12, 1  ;;  %vm569_vm10 = vcmp.eq.s32.totalorder %v1148_v12, 2 }
 0x2fa   : > { %s753_s9 = sshll.u32 %s1051_s22, 7  ;;  %s308_s14 = scalar_lea.vmem [#allocation7], %s734_s7 }
 0x2fb   : > { %vm560_vm7 = vcmp.eq.s32.totalorder %v559_v36, 0  ;;  %s606_s15 = sshll.u32 %s308_s14, 4  ;;  %s1184_s13 = scalar_lea.hbm %s1226_s5, %s753_s9  ;;  %s607_s15 = int_to_ptr.vmem [resolvable:$true] %s606_s15 }
 0x2fc   : > { %vm562_vm11 = vmand %vm560_vm7, %vm561_vm8  ;;  %s580_s17 = scalar_lea.sflag [#allocation8], %s1108_s28  ;;  %s922_s23 = scalar_lea.vmem %s607_s15, 128 }
 0x2fd   : > { %vm566_vm12 = vmand %vm560_vm7, %vm565_vm9  ;;  %p923_p12 = scmp.ne.s32.totalorder %s607_s15, %s922_s23  ;;  %s999_s7 = smov [#allocation7]  }
 0x2fe   : > { %vm570_vm13 = vmand %vm560_vm7, %vm569_vm10  ;;  %s926_s25 = sshll.u32 %s999_s7, 4  ;;  %s927_s25 = int_to_ptr.vmem [resolvable:$false] %s926_s25 }
 0x2ff   : > { %p924_p13 = pnand %p923_p12, %p1232_p10  ;;  %s928_s26 = scalar_lea.vmem %s927_s25, 256 }
 0x300   : > { %p929_p1 = scmp.lt.s32.totalorder %s607_s15, %s927_s25  ;;  %p930_p2 = scmp.lt.s32.totalorder %s928_s26, %s922_s23 }
 0x301   : > { %p925_p0 = pneg %p924_p13 }
 0x302   : > { %p931_p3 = por %p930_p2, %p929_p1 }
 0x304   : > { %p932_p4 = pnand %p931_p3, %p925_p0 }
 0x308   : > { %s779_s8 = spop %778 }
 0x36d   : > { %v540_v2 = vpop.xlane.xlu1 %539 }
 0x36e   : > { %v541_v16 = vrot.slane %v540_v2, 4 }
 0x370   : > { %v542_v18 = vadd.f32 %v541_v16, %v540_v2 }
 0x371   : > { %v550_v17 = vpop.xlane.xlu1 %549 }
 0x372   : > { %v551_v19 = vrot.slane %v550_v17, 4  ;;  %v543_v21 = vrot.slane %v542_v18, 2 }
 0x374   : > { %v552_v20 = vadd.f32 %v551_v19, %v550_v17  ;;  %v544_v26 = vadd.f32 %v543_v21, %v542_v18 }
 0x376   : > { %v519_v22 = vpop.xlane.xlu0 %518  ;;  %v553_v23 = vrot.slane %v552_v20, 2  ;;  %v545_v30 = vrot.slane %v544_v26, 1 }
 0x377   : > { %v520_v24 = vrot.slane %v519_v22, 4 }
 0x378   : > { %v554_v27 = vadd.f32 %v553_v23, %v552_v20  ;;  %v546_v34 = vadd.f32 %v545_v30, %v544_v26 }
 0x379   : > { %v521_v25 = vadd.f32 %v520_v24, %v519_v22 }
 0x37a   : > { %v555_v32 = vrot.slane %v554_v27, 1 }
 0x37b   : > { %v522_v28 = vrot.slane %v521_v25, 2 }
 0x37c   : > { %v556_v35 = vadd.f32 %v555_v32, %v554_v27 }
 0x37d   : > { %v523_v29 = vadd.f32 %v522_v28, %v521_v25 }
 0x37f   : > { %v524_v31 = vrot.slane %v523_v29, 1 }
 0x381   : > { %v525_v33 = vadd.f32 %v524_v31, %v523_v29 }
 0x383   : > { %780 = vpush %v525_v33 }
 0x384   : > { %782 = vpush %v546_v34 }
 0x385   : > { %784 = vpush %v556_v35 }
 0x3b4   : > { %s781_s6 = spop %780 }
 0x3b5   : > { %s527_s10 = ssub.f32 %s779_s8, %s781_s6  ;;  %s783_s11 = spop %782 }
 0x3b6   : > { %s785_s12 = spop %784  ;;  %v567_v39 = vstv %s783_s11 }
 0x3b7   : > { %v563_v37 = vstv %s527_s10  ;;  %v571_v41 = vstv %s785_s12 }
 0x3b8   : > { %v564_v38 = vsel %vm562_vm11, %v563_v37, 0.0 }
 0x3b9   : > { %v568_v40 = vsel %vm566_vm12, %v567_v39, %v564_v38 }
 0x3ba   : > { %v572_v42 = vsel %vm570_vm13, %v571_v41, %v568_v40 }
 0x3bb   : > { %573 = vst [vmem:[%s308_s14] sm:$0xff] %v572_v42 }
 0x3bc   : > { %935 = shalt.err (!%p932_p4)
}
 0x3bd   : > { %s936_s8 = scalar_lea.hbm %s1184_s13, 128  ;;  %s940_s9 = scalar_lea.hbm %s1226_s5, 256 }
 0x3be   : > { %p937_p7 = scmp.ne.s32.totalorder %s1184_s13, %s936_s8  ;;  %p941_p6 = scmp.lt.s32.totalorder %s1184_s13, %s1226_s5 }
 0x3bf   : > { %p942_p11 = scmp.lt.s32.totalorder %s940_s9, %s936_s8 }
 0x3c0   : > { %p938_p8 = pnand %p937_p7, %p1232_p10 }
 0x3c1   : > { %p943_p12 = por %p942_p11, %p941_p6 }
 0x3c2   : > { %p939_p5 = pneg %p938_p8 }
 0x3c4   : > { %p944_p13 = pnand %p943_p12, %p939_p5 }
 0x3c6   : > { %947 = shalt.err (!%p944_p13)
}
 0x3c7   : > { %791 = dma.vmem_to_hbm [thread:$0]  (%p1232_p10), %s607_s15, 128, %s1184_s13, %s580_s17  }
 0x3c8 PF: > { %s618_s12 = sand.u32 1, %s978_s18   ;;  %p1233_p0 = scmp.ne.s32.totalorder %s1230_s30, 0 }
 0x3c9   : > { %s619_s14 = scalar_lea.sflag [#allocation5], %s618_s12 }
 0x3ca   : > { %p799_p1 = pnand %p730_p9, %p1233_p0 }
 0x3cc   : > { %p800_p2 = pneg %p799_p1 }
 0x3ce   : > { %969 = dma.done.wait (%p800_p2), %s619_s14, 64  }
 0x3cf   : > { %971 = vsyncadd (%p800_p2), %s619_s14, 4294967232  ;;  %s628_s22 = scalar_lea.sflag [#allocation8], %s618_s12 }
 0x3d0   : > { %973 = dma.done.wait (%p800_p2), %s628_s22, 128  }
 0x3d1   : > { %975 = vsyncadd (%p800_p2), %s628_s22, 4294967168  ;;  %p20_p10 = scmp.ge.s32.totalorder %s1055_s24, 4   ;;  %s1234_s18 = smov %s982_s19 }
 0x3d2   : > { %s1235_s19 = smov %s986_s20  ;;  %s1236_s20 = smov %s1067_s27 }
 0x3d3   : > { %s1237_s21 = smov %s1055_s24  ;;  %22 = sbr.rel (!%p20_p10) target bundleno = 6 (0x6), region = 145 }
 0x3d8   :  { %633 = vsyncpa [#allocation4], 1 }
 0x3d9   :  { %635 = vsyncpa [#allocation4 + $0x1], 1 }
 0x3da   :  { %636 = vsyncpa [#allocation5], 1 }
 0x3db   :  { %638 = vsyncpa [#allocation5 + $0x1], 1 }
 0x3dc   :  { %639 = vsyncpa [#allocation8], 1 }
 0x3dd   :  { %641 = vsyncpa [#allocation8 + $0x1], 1 }

// kernel: tpu_custom_call.1
= control target key start
LH: loop header
LB: loop body
LE: loop exit
PB: predicated region body
PF: predicated region fallthrough
CT: control target
= control target key end

     0   :  { %11 = vsyncpa [#allocation4], 0  ;;  %s1221_s0 = inlined_call_operand.vmem [shape: s32[16,1], index: 0, kind: input, shape index: {}]   ;;  %s1222_s1 = inlined_call_operand.vmem [shape: bf16[2,16,32], index: 1, kind: input, shape index: {}]   ;;  %s1223_s2 = inlined_call_operand.hbm [shape: bf16[2,32,128], index: 2, kind: input, shape index: {}]   ;;  %s1224_s3 = inlined_call_operand.vmem [shape: f32[2,1,128], index: 3, kind: input, shape index: {}]   ;;  %s1225_s4 = inlined_call_operand.hbm [shape: bf16[16,128], index: 4, kind: output, shape index: {0}]   ;;  %s1226_s5 = inlined_call_operand.hbm [shape: f32[16,128], index: 5, kind: output, shape index: {1}]  }
   0x1   :  { %12 = vsyncpa [#allocation5], 0 }
   0x2   :  { %14 = vsyncpa [#allocation5 + $0x1], 0 }
   0x3   :  { %15 = vsyncpa [#allocation8], 0 }
   0x4   :  { %17 = vsyncpa [#allocation8 + $0x1], 0  ;;  %s1030_s18 = smov 0   ;;  %s1032_s19 = smov 0  }
   0x5   :  { %s1034_s20 = smov 0   ;;  %s1036_s21 = smov 0  }
   0x6 LB: > { %s1051_s22 = sadd.s32 4294967295, %s990_s21   ;;  %s727_s23 = sadd.s32 4294967294, %s990_s21   ;;  %s990_s21 = sphi %s1036_s21, %s1237_s21   ;;  %s986_s20 = sphi %s1034_s20, %s1236_s20   ;;  %s982_s19 = sphi %s1032_s19, %s1235_s19   ;;  %s978_s18 = sphi %s1030_s18, %s1234_s18  }
   0x7   : > { %s1055_s24 = sadd.s32 1, %s990_s21   ;;  %s56_s25 = sadd.s32 1, %s986_s20 }
   0x8   : > { %s53_s26 = ssub.s32 %s990_s21, %s1055_s24  ;;  %p63_p0 = scmp.ne.s32.totalorder %s986_s20, %s982_s19 }
   0x9   : > { %p54_p1 = scmp.eq.s32.totalorder %s53_s26, 0  ;;  %p64_p2 = scmp.eq.s32.totalorder %s990_s21, 0 }
   0xa   : > { %p135_p3 = scmp.eq.s32.totalorder %s1051_s22, 1  ;;  %p140_p4 = scmp.ne.s32.totalorder %s982_s19, %s978_s18 }
   0xb   : > { %s1067_s27 = scalar_select %p54_p1, %s986_s20, %s56_s25  }
   0xc   : > { %p1069_p5 = por %p64_p2, %p63_p0  ;;  %p1073_p6 = por %p135_p3, %p63_p0 }
   0xd   : > { %p141_p7 = scmp.eq.s32.totalorder %s727_s23, 1  ;;  %p728_p8 = scmp.ge.s32.totalorder %s990_s21, 1 }
   0xe   : > { %s1229_s29 = scalar_select %p1073_p6, 1, 0 }
   0xf   : > { %p174_p9 = scmp.lt.s32.totalorder %s990_s21, 3  ;;  %p1079_p10 = por %p141_p7, %p140_p4 }
  0x10   : > { %p805_p11 = scmp.eq.s32.totalorder %s1051_s22, 0  ;;  %s992_s7 = smov [#allocation3]  }
  0x11   : > { %s1230_s30 = scalar_select %p1079_p10, 1, 0 }
  0x12   : > { %p1084_p12 = pnand %p728_p8, %p174_p9  ;;  %s186_s8 = sshll.u32 %s992_s7, 4  ;;  %s187_s8 = int_to_ptr.vmem [resolvable:$true] %s186_s8 }
  0x13   : > { %s881_s9 = scalar_lea.vmem %s187_s8, 512  ;;  %p889_p7 = scmp.lt.s32.totalorder %s187_s8, %s187_s8 }
  0x14   : > { %p794_p13 = pneg %p1084_p12  ;;  %p882_p2 = scmp.ne.s32.totalorder %s187_s8, %s881_s9 }
  0x15   : > { %p890_p10 = scmp.lt.s32.totalorder %s881_s9, %s881_s9 }
  0x16   : > { %p795_p0 = pnand %p805_p11, %p794_p13 }
  0x17   : > { %p891_p6 = por %p890_p10, %p889_p7 }
  0x18   : > { %p872_p1 = pneg %p795_p0 }
  0x1a   : > { %p884_p3 = pnand %p882_p2, %p872_p1 }
  0x1c   : > { %p885_p4 = pneg %p884_p3 }
  0x1e   : > { %p892_p8 = pnand %p891_p6, %p885_p4 }
  0x20   : > { %895 = shalt.err (!%p892_p8)
}
  0x21   : > { %s993_s10 = smov 64   ;;  %s994_s11 = smov 4  }
  0x22   : > { %797 = dma.hbm_to_vmem [thread:$0]  (!%p795_p0), %s1223_s2, 512, %s187_s8, [#allocation4], %s993_s10, %s993_s10, %s994_s11  }
  0x23   : > { %p730_p9 = scmp.ge.s32.totalorder %s990_s21, 2 }
  0x25   : > { %199 = sbr.rel (%p730_p9) target bundleno = 47 (0x2f), region = 24 }
  0x2a   : > { %209 = sbr.rel (!%p1069_p5) target bundleno = 47 (0x2f), region = 32  ;;  %s211_s14 = sand.u32 (%p1069_p5), 1, %s986_s20  }
  0x2b   : > { %s732_s15 = sshll.u32 (%p1069_p5), %s990_s21, 2  ;;  %s731_s16 = sshll.u32 (%p1069_p5), %s211_s14, 3 }
  0x2c   : > { %s215_s25 = scalar_lea.vmem (%p1069_p5), %s1222_s1, %s732_s15  ;;  %s213_s26 = scalar_lea.vmem (%p1069_p5), [#allocation2], %s731_s16 }
  0x2d   : > { %v232_v0 = vld [vmem:[%s215_s25] sm:$0xf] (%p1069_p5)  ;;  %v234_v1 = vld [vmem:[%s215_s25 + $0x8] sm:$0xf] (%p1069_p5) }
  0x2e   : > { %233 = vst [vmem:[%s213_s26] sm:$0xf] (%p1069_p5), %v232_v0  ;;  %235 = vst [vmem:[%s213_s26 + $0x4] sm:$0xf] (%p1069_p5), %v234_v1 }
  0x2f PF: > { %266 = sbr.rel (%p1084_p12) target bundleno = 968 (0x3c8), region = 73  ;;  %s1108_s28 = sand.u32 (!%p1084_p12), 1, %s982_s19  }
  0x30   : > { %s734_s7 = sshll.u32 (!%p1084_p12), %s1108_s28, 3 }
  0x31   : > { %s271_s8 = scalar_lea.vmem (!%p1084_p12), [#allocation2], %s734_s7 }
  0x34   : > { %965 = dma.done.wait (%p805_p11), [#allocation4], 512  }
  0x35   : > { %967 = vsyncadd (%p805_p11), [#allocation4], 4294966784  ;;  %v995_v2 = vmov 0.0   ;;  %vm996_vm0 = vmmov 0   ;;  %v848_v3 = vld [vmem:[#allocation3 + $0x8] sm:$0xff]   ;;  %v849_v4 = vld [vmem:[#allocation3 + $0x18] sm:$0xff]  }
  0x36   : > { %762 = vmatprep.subr.bf16.mxu0 %v995_v2  ;;  %770 = vmatprep.subr.bf16.mxu1 %v995_v2  ;;  %v850_v5 = vld [vmem:[#allocation3] sm:$0xff]   ;;  %v851_v6 = vld [vmem:[#allocation3 + $0x10] sm:$0xff]   ;;  %vm342_vm1 = vcmask 261120   ;;  %s736_s10 = sshll.u32 %s1108_s28, 2  ;;  %v997_v22 = vmov 0   ;;  %p309_p5 = scmp.lt.s32.totalorder %s1051_s22, 1 }
  0x37   : > { %766 = vmatprep.mubr.msk.bf16.mxu0 %vm996_vm0, %v995_v2  ;;  %774 = vmatprep.mubr.msk.bf16.mxu1 %vm996_vm0, %v995_v2  ;;  %v318_v7 = vld [vmem:[%s271_s8] sm:$0xf]  ;;  %v744_v8 = vld [vmem:[%s271_s8 + $0x4] sm:$0xf]  ;;  %s1130_s13 = scalar_lea.vmem [#allocation6], %s736_s10  ;;  %vm507_vm3 = vcmask 7168  }
  0x38   : > { %763 = vmatpush3.bf16.msra.mxu0 %v848_v3  ;;  %771 = vmatpush3.bf16.msra.mxu1 %v849_v4  ;;  %v740_v9 = vld [vmem:[%s1224_s3] ss:$0 sm:$0xff]  ;;  %v746_v11 = vld [vmem:[%s1224_s3 + $0x1] ss:$0 sm:$0xff]  ;;  %s310_s14 = scalar_select %p309_p5, %s1051_s22, 1 }
  0x39   : > { %764 = vmatprep.subr.bf16.mxu0 %v995_v2  ;;  %772 = vmatprep.subr.bf16.mxu1 %v995_v2  ;;  %s752_s25 = sshll.u32 %s1051_s22, 6  ;;  %s593_s9 = sshll.u32 %s1130_s13, 4  ;;  %s594_s9 = int_to_ptr.vmem [resolvable:$true] %s593_s9 }
  0x3a   : > { %846 = vset.pattern.permute.xlu1 %v997_v22  ;;  %847 = vset.pattern.permute.xlu0 %v997_v22  ;;  %s738_s15 = sshll.u32 %s310_s14, 3  ;;  %s591_s6 = scalar_lea.hbm %s1225_s4, %s752_s25 }
  0x3b   : > { %s312_s23 = scalar_lea.vmem %s1221_s0, %s738_s15  ;;  %s575_s10 = scalar_lea.sflag [#allocation5], %s1108_s28 }
  0x3c   : > { %765 = vmatpush3.bf16.msra.mxu0 %v850_v5  ;;  %773 = vmatpush3.bf16.msra.mxu1 %v851_v6  ;;  %v314_v32 = vld [vmem:[%s312_s23] sm:$0xff]  ;;  %s896_s11 = scalar_lea.vmem %s594_s9, 64  ;;  %p1232_p10 = scmp.ne.s32.totalorder %s1229_s29, 0 }
  0x3d   : > { %vm315_vm2 = vcmp.ne.s32.totalorder %v314_v32, 4294967295  ;;  %p897_p6 = scmp.ne.s32.totalorder %s594_s9, %s896_s11  ;;  %s998_s12 = smov [#allocation6]  }
  0x3e   : > { %v316_v61 = vsel %vm315_vm2, 1, %v997_v22  ;;  %s900_s14 = sshll.u32 %s998_s12, 4  ;;  %s901_s14 = int_to_ptr.vmem [resolvable:$false] %s900_s14 }
  0x3f   : > { %767 = vmatmul.mubr.msk.bf16.vlgmr.msra.gmra.mxu0 %vm342_vm1, %v318_v7  ;;  %775 = vmatmul.mubr.msk.bf16.vlgmr.msra.gmra.mxu1 %vm342_vm1, %v744_v8  ;;  %v494_v7 = vlaneseq  ;;  %p898_p11 = pnand %p897_p6, %p1232_p10  ;;  %s902_s15 = scalar_lea.vmem %s901_s14, 128 }
  0x40   : > { %p903_p13 = scmp.lt.s32.totalorder %s594_s9, %s901_s14  ;;  %p904_p0 = scmp.lt.s32.totalorder %s902_s15, %s896_s11 }
  0x41   : > { %p899_p12 = pneg %p898_p11 }
  0x42   : > { %p905_p1 = por %p904_p0, %p903_p13 }
  0x44   : > { %p906_p2 = pnand %p905_p1, %p899_p12 }
  0xff   : > { %v380_v10 = vpop.f32.mrf.mxu0  ;;  %v470_v13 = vpop.f32.mrf.mxu1 }
 0x100   : > { %v381_v12 = vadd.f32 %v740_v9, %v380_v10  ;;  %v471_v16 = vadd.f32 %v746_v11, %v470_v13  ;;  %v739_v10 = vsel %vm315_vm2, 1.0, %v995_v2 }
 0x101   : > { %v768_v14 = vpop.f32.mrf.mxu0  ;;  %v776_v17 = vpop.f32.mrf.mxu1  ;;  %v548_v13 = vsel %vm507_vm3, %v739_v10, 0.0 }
 0x102   : > { %v386_v15 = vpack.c.bf16 %v381_v12, %v381_v12  ;;  %388 = vmax.xlane.f32.xlu0 %v381_v12 }
 0x103   : > { %v383_v18 = vpop.f32.mrf.mxu0  ;;  %v473_v19 = vpop.f32.mrf.mxu1 }
 0x104   : > { %387 = vst [vmem:[%s1130_s13] sm:$0xf] %v386_v15 }
 0x105   : > { %v769_v20 = vpop.f32.mrf.mxu0  ;;  %v777_v21 = vpop.f32.mrf.mxu1 }
 0x106   : > { %476 = vmax.xlane.f32.xlu0 %v471_v16 }
 0x18b   : > { %v389_v23 = vpop.xlane.xlu0 %388 }
 0x18c   : > { %v390_v24 = vsub.f32 %v381_v12, %v389_v23  ;;  %v1148_v12 = vand.u32 127, %v494_v7 }
 0x18e   : > { %v391_v25 = vmul.f32 1.442695, %v390_v24 }
 0x18f   : > { %v477_v26 = vpop.xlane.xlu0 %476 }
 0x190   : > { %852 = vpow2.f32 %v391_v25  ;;  %v478_v27 = vsub.f32 %v471_v16, %v477_v26 }
 0x192   : > { %v479_v28 = vmul.f32 1.442695, %v478_v27  ;;  %v1133_v29 = vadd.f32 %v478_v27, %v390_v24 }
 0x194   : > { %854 = vpow2.f32 %v479_v28 }
 0x19d   : > { %v853_v30 = vpop.eup %852 }
 0x19e   : > { %393 = vadd.xlane.f32.xlu1 %v853_v30 }
 0x1a1   : > { %v855_v31 = vpop.eup %854 }
 0x1a2   : > { %481 = vadd.xlane.f32.xlu1 %v855_v31 }
 0x1b3   : > { %497 = vperm.xlu1 %846, %v314_v32  }
 0x227   : > { %v394_v33 = vpop.xlane.xlu1 %393 }
 0x228   : > { %856 = vrcp.f32 %v394_v33 }
 0x229   : > { %858 = vlog2.f32 %v394_v33 }
 0x22b   : > { %v482_v34 = vpop.xlane.xlu1 %481 }
 0x22c   : > { %860 = vrcp.f32 %v482_v34 }
 0x22d   : > { %862 = vlog2.f32 %v482_v34 }
 0x22f   : > { %v498_v62 = vpop.permute.xlu1 %497 }
 0x230   : > { %vm499_vm4 = vcmp.eq.s32.totalorder %v1148_v12, %v498_v62 }
 0x235   : > { %v857_v35 = vpop.eup %856 }
 0x236   : > { %v859_v36 = vpop.eup %858  ;;  %v396_v37 = vmul.f32 %v857_v35, %v853_v30 }
 0x237   : > { %v404_v41 = vmul.f32 0.6931472, %v859_v36 }
 0x238   : > { %v398_v43 = vadd.f32 1e-05, %v396_v37 }
 0x239   : > { %v861_v38 = vpop.eup %860 }
 0x23a   : > { %v863_v39 = vpop.eup %862  ;;  %v484_v40 = vmul.f32 %v861_v38, %v855_v31 }
 0x23b   : > { %v492_v42 = vmul.f32 0.6931472, %v863_v39 }
 0x23c   : > { %v485_v44 = vadd.f32 %v484_v40, %v396_v37  ;;  %v486_v45 = vadd.f32 1e-05, %v484_v40 }
 0x23d   : > { %v493_v46 = vadd.f32 %v492_v42, %v404_v41 }
 0x23e   : > { %864 = vlog2.f32 %v486_v45  ;;  %v528_v47 = vmul.f32 0.5, %v485_v44 }
 0x23f   : > { %v506_v48 = vsel %vm315_vm2, %v493_v46, 0.0  ;;  %866 = vlog2.f32 %v398_v43 }
 0x240   : > { %v508_v49 = vsel %vm507_vm3, %v506_v48, 0.0  ;;  %v529_v50 = vadd.f32 1e-05, %v528_v47 }
 0x241   : > { %509 = vadd.xlane.f32.xlu1 %v508_v49 }
 0x242   : > { %868 = vlog2.f32 %v529_v50 }
 0x24b   : > { %v865_v51 = vpop.eup %864 }
 0x24c   : > { %v867_v52 = vpop.eup %866  ;;  %v488_v53 = vmul.f32 0.6931472, %v865_v51 }
 0x24d   : > { %v400_v55 = vmul.f32 0.6931472, %v867_v52 }
 0x24f   : > { %v869_v54 = vpop.eup %868  ;;  %v489_v57 = vadd.f32 %v488_v53, %v400_v55 }
 0x250   : > { %v531_v56 = vmul.f32 0.6931472, %v869_v54 }
 0x252   : > { %v532_v58 = vmul.f32 2.0, %v531_v56 }
 0x254   : > { %v533_v59 = vsub.f32 %v532_v58, %v489_v57 }
 0x256   : > { %v534_v60 = vmul.f32 %v533_v59, %v528_v47 }
 0x258   : > { %535 = vadd.xlane.f32.xlu0 %v534_v60 }
 0x26e   : > { %501 = vperm.xlu0 %847, %v316_v61  }
 0x2ca   : > { %v510_v63 = vpop.xlane.xlu1 %509 }
 0x2cb   : > { %v511_v0 = vrot.slane %v510_v63, 4 }
 0x2cd   : > { %v512_v1 = vadd.f32 %v511_v0, %v510_v63 }
 0x2cf   : > { %v513_v3 = vrot.slane %v512_v1, 2 }
 0x2d1   : > { %v514_v4 = vadd.f32 %v513_v3, %v512_v1 }
 0x2d3   : > { %v515_v5 = vrot.slane %v514_v4, 1 }
 0x2d5   : > { %v516_v6 = vadd.f32 %v515_v5, %v514_v4 }
 0x2d7   : > { %778 = vpush %v516_v6 }
 0x2e1   : > { %v536_v8 = vpop.xlane.xlu0 %535 }
 0x2e2   : > { %v537_v9 = vsel %vm315_vm2, %v536_v8, 0.0 }
 0x2e3   : > { %v538_v11 = vsel %vm507_vm3, %v537_v9, 0.0 }
 0x2e4   : > { %539 = vadd.xlane.f32.xlu1 %v538_v11 }
 0x2e8   : > { %549 = vadd.xlane.f32.xlu1 %v548_v13 }
 0x2e9   : > { %v502_v14 = vpop.permute.xlu0 %501 }
 0x2ea   : > { %vm503_vm5 = vcmp.eq.s32.totalorder %v502_v14, 1 }
 0x2eb   : > { %vm504_vm6 = vmand %vm499_vm4, %vm503_vm5 }
 0x2ec   : > { %v505_v15 = vsel %vm504_vm6, %v1133_v29, 0.0 }
 0x2ed   : > { %518 = vadd.xlane.f32.xlu0 %v505_v15 }
 0x2ee   : > { %909 = shalt.err (!%p906_p2)
}
 0x2ef   : > { %s910_s16 = scalar_lea.hbm %s591_s6, 64  ;;  %s914_s23 = scalar_lea.hbm %s1225_s4, 128 }
 0x2f0   : > { %p911_p3 = scmp.ne.s32.totalorder %s591_s6, %s910_s16  ;;  %p915_p8 = scmp.lt.s32.totalorder %s591_s6, %s1225_s4 }
 0x2f1   : > { %p916_p5 = scmp.lt.s32.totalorder %s914_s23, %s910_s16 }
 0x2f2   : > { %p912_p4 = pnand %p911_p3, %p1232_p10 }
 0x2f3   : > { %p917_p6 = por %p916_p5, %p915_p8 }
 0x2f4   : > { %p913_p7 = pneg %p912_p4 }
 0x2f6   : > { %p918_p11 = pnand %p917_p6, %p913_p7 }
 0x2f8   : > { %921 = shalt.err (!%p918_p11)
}
 0x2f9   : > { %790 = dma.vmem_to_hbm [thread:$0]  (%p1232_p10), %s594_s9, 64, %s591_s6, %s575_s10   ;;  %v559_v36 = vshrl.u32 %v494_v7, 7  ;;  %vm561_vm8 = vcmp.eq.s32.totalorder %v1148_v12, 0  ;;  %vm565_vm9 = vcmp.eq.s32.totalorder %v1148_v12, 1  ;;  %vm569_vm10 = vcmp.eq.s32.totalorder %v1148_v12, 2 }
 0x2fa   : > { %s753_s9 = sshll.u32 %s1051_s22, 7  ;;  %s308_s14 = scalar_lea.vmem [#allocation7], %s734_s7 }
 0x2fb   : > { %vm560_vm7 = vcmp.eq.s32.totalorder %v559_v36, 0  ;;  %s606_s15 = sshll.u32 %s308_s14, 4  ;;  %s1184_s13 = scalar_lea.hbm %s1226_s5, %s753_s9  ;;  %s607_s15 = int_to_ptr.vmem [resolvable:$true] %s606_s15 }
 0x2fc   : > { %vm562_vm11 = vmand %vm560_vm7, %vm561_vm8  ;;  %s580_s17 = scalar_lea.sflag [#allocation8], %s1108_s28  ;;  %s922_s23 = scalar_lea.vmem %s607_s15, 128 }
 0x2fd   : > { %vm566_vm12 = vmand %vm560_vm7, %vm565_vm9  ;;  %p923_p12 = scmp.ne.s32.totalorder %s607_s15, %s922_s23  ;;  %s999_s7 = smov [#allocation7]  }
 0x2fe   : > { %vm570_vm13 = vmand %vm560_vm7, %vm569_vm10  ;;  %s926_s25 = sshll.u32 %s999_s7, 4  ;;  %s927_s25 = int_to_ptr.vmem [resolvable:$false] %s926_s25 }
 0x2ff   : > { %p924_p13 = pnand %p923_p12, %p1232_p10  ;;  %s928_s26 = scalar_lea.vmem %s927_s25, 256 }
 0x300   : > { %p929_p1 = scmp.lt.s32.totalorder %s607_s15, %s927_s25  ;;  %p930_p2 = scmp.lt.s32.totalorder %s928_s26, %s922_s23 }
 0x301   : > { %p925_p0 = pneg %p924_p13 }
 0x302   : > { %p931_p3 = por %p930_p2, %p929_p1 }
 0x304   : > { %p932_p4 = pnand %p931_p3, %p925_p0 }
 0x308   : > { %s779_s8 = spop %778 }
 0x36d   : > { %v540_v2 = vpop.xlane.xlu1 %539 }
 0x36e   : > { %v541_v16 = vrot.slane %v540_v2, 4 }
 0x370   : > { %v542_v18 = vadd.f32 %v541_v16, %v540_v2 }
 0x371   : > { %v550_v17 = vpop.xlane.xlu1 %549 }
 0x372   : > { %v551_v19 = vrot.slane %v550_v17, 4  ;;  %v543_v21 = vrot.slane %v542_v18, 2 }
 0x374   : > { %v552_v20 = vadd.f32 %v551_v19, %v550_v17  ;;  %v544_v26 = vadd.f32 %v543_v21, %v542_v18 }
 0x376   : > { %v519_v22 = vpop.xlane.xlu0 %518  ;;  %v553_v23 = vrot.slane %v552_v20, 2  ;;  %v545_v30 = vrot.slane %v544_v26, 1 }
 0x377   : > { %v520_v24 = vrot.slane %v519_v22, 4 }
 0x378   : > { %v554_v27 = vadd.f32 %v553_v23, %v552_v20  ;;  %v546_v34 = vadd.f32 %v545_v30, %v544_v26 }
 0x379   : > { %v521_v25 = vadd.f32 %v520_v24, %v519_v22 }
 0x37a   : > { %v555_v32 = vrot.slane %v554_v27, 1 }
 0x37b   : > { %v522_v28 = vrot.slane %v521_v25, 2 }
 0x37c   : > { %v556_v35 = vadd.f32 %v555_v32, %v554_v27 }
 0x37d   : > { %v523_v29 = vadd.f32 %v522_v28, %v521_v25 }
 0x37f   : > { %v524_v31 = vrot.slane %v523_v29, 1 }
 0x381   : > { %v525_v33 = vadd.f32 %v524_v31, %v523_v29 }
 0x383   : > { %780 = vpush %v525_v33 }
 0x384   : > { %782 = vpush %v546_v34 }
 0x385   : > { %784 = vpush %v556_v35 }
 0x3b4   : > { %s781_s6 = spop %780 }
 0x3b5   : > { %s527_s10 = ssub.f32 %s779_s8, %s781_s6  ;;  %s783_s11 = spop %782 }
 0x3b6   : > { %s785_s12 = spop %784  ;;  %v567_v39 = vstv %s783_s11 }
 0x3b7   : > { %v563_v37 = vstv %s527_s10  ;;  %v571_v41 = vstv %s785_s12 }
 0x3b8   : > { %v564_v38 = vsel %vm562_vm11, %v563_v37, 0.0 }
 0x3b9   : > { %v568_v40 = vsel %vm566_vm12, %v567_v39, %v564_v38 }
 0x3ba   : > { %v572_v42 = vsel %vm570_vm13, %v571_v41, %v568_v40 }
 0x3bb   : > { %573 = vst [vmem:[%s308_s14] sm:$0xff] %v572_v42 }
 0x3bc   : > { %935 = shalt.err (!%p932_p4)
}
 0x3bd   : > { %s936_s8 = scalar_lea.hbm %s1184_s13, 128  ;;  %s940_s9 = scalar_lea.hbm %s1226_s5, 256 }
 0x3be   : > { %p937_p7 = scmp.ne.s32.totalorder %s1184_s13, %s936_s8  ;;  %p941_p6 = scmp.lt.s32.totalorder %s1184_s13, %s1226_s5 }
 0x3bf   : > { %p942_p11 = scmp.lt.s32.totalorder %s940_s9, %s936_s8 }
 0x3c0   : > { %p938_p8 = pnand %p937_p7, %p1232_p10 }
 0x3c1   : > { %p943_p12 = por %p942_p11, %p941_p6 }
 0x3c2   : > { %p939_p5 = pneg %p938_p8 }
 0x3c4   : > { %p944_p13 = pnand %p943_p12, %p939_p5 }
 0x3c6   : > { %947 = shalt.err (!%p944_p13)
}
 0x3c7   : > { %791 = dma.vmem_to_hbm [thread:$0]  (%p1232_p10), %s607_s15, 128, %s1184_s13, %s580_s17  }
 0x3c8 PF: > { %s618_s12 = sand.u32 1, %s978_s18   ;;  %p1233_p0 = scmp.ne.s32.totalorder %s1230_s30, 0 }
 0x3c9   : > { %s619_s14 = scalar_lea.sflag [#allocation5], %s618_s12 }
 0x3ca   : > { %p799_p1 = pnand %p730_p9, %p1233_p0 }
 0x3cc   : > { %p800_p2 = pneg %p799_p1 }
 0x3ce   : > { %969 = dma.done.wait (%p800_p2), %s619_s14, 64  }
 0x3cf   : > { %971 = vsyncadd (%p800_p2), %s619_s14, 4294967232  ;;  %s628_s22 = scalar_lea.sflag [#allocation8], %s618_s12 }
 0x3d0   : > { %973 = dma.done.wait (%p800_p2), %s628_s22, 128  }
 0x3d1   : > { %975 = vsyncadd (%p800_p2), %s628_s22, 4294967168  ;;  %p20_p10 = scmp.ge.s32.totalorder %s1055_s24, 4   ;;  %s1234_s18 = smov %s982_s19 }
 0x3d2   : > { %s1235_s19 = smov %s986_s20  ;;  %s1236_s20 = smov %s1067_s27 }
 0x3d3   : > { %s1237_s21 = smov %s1055_s24  ;;  %22 = sbr.rel (!%p20_p10) target bundleno = 6 (0x6), region = 145 }
 0x3d8   :  { %633 = vsyncpa [#allocation4], 1 }
 0x3d9   :  { %635 = vsyncpa [#allocation4 + $0x1], 1 }
 0x3da   :  { %636 = vsyncpa [#allocation5], 1 }
 0x3db   :  { %638 = vsyncpa [#allocation5 + $0x1], 1 }
 0x3dc   :  { %639 = vsyncpa [#allocation8], 1 }
 0x3dd   :  { %641 = vsyncpa [#allocation8 + $0x1], 1 }

</bundles_post_ra>
